<compile_context>
chip_gen: v7x
topology: tpu7x:2x2x1
jax: 0.10.0
libtpu: 0.0.40
codegen_flags: <defaults>
</compile_context>

<pallas_src>
import functools

import jax
import jax.numpy as jnp
from jax import lax
from jax.experimental import pallas as pl
from jax.experimental.pallas import tpu as pltpu


# ----------------------------------------------------------------------------
# Fused kernel
# ----------------------------------------------------------------------------
def _fused_encoder_attention_kernel(
        x_ref, wqkv_ref, bqkv_ref, wp_ref, bp_ref, g_ref, b_ref,
        w1_ref, b1_ref, w2_ref, b2_ref, o_ref,
        view_scr, y_scr, oh_scr, *,
        num_heads, seq_len, batch_per_step, scale, add_norm, eps):
    H, S, Bt = num_heads, seq_len, batch_per_step
    E = wp_ref.shape[0]
    Dh = E // H
    G = S // H                  # ".view" output rows owned by one head (per batch)
    bf16 = jnp.bfloat16
    f = pl.program_id(1)        # FFN K-chunk index (inner, "arbitrary" axis)

    # ---- attention + proj + residual + LayerNorm: once per row block -------
    @pl.when(f == 0)
    def _attention():
        x_bf = x_ref[...]                                              # (R, E) bf16
        # Fused lane-dense QKV projection: bf16 MXU operands, f32 accumulation.
        qkv = jnp.dot(x_bf, wqkv_ref[...],
                      preferred_element_type=jnp.float32) + bqkv_ref[...]

        for bt in range(Bt):                  # static loop over batch elements
            r0 = bt * S
            qkv_b = qkv[r0:r0 + S, :]                                  # (S, 3E) f32
            for h in range(H):                # static loop over heads
                c0 = h * Dh
                qh = qkv_b[:, c0:c0 + Dh].astype(bf16)
                kh = qkv_b[:, E + c0:E + c0 + Dh].astype(bf16)
                vh = qkv_b[:, 2 * E + c0:2 * E + c0 + Dh].astype(bf16)
                # A = Q K^T / sqrt(embed_dim)  (module divides by sqrt(E), not
                # sqrt(Dh); intentional, do not "fix").
                a = lax.dot_general(qh, kh, (((1,), (1,)), ((), ())),
                                    preferred_element_type=jnp.float32) * scale
                a = a - jnp.max(a, axis=-1, keepdims=True)
                p = jnp.exp(a)
                p = p * pl.reciprocal(jnp.sum(p, axis=-1, keepdims=True),
                                      approx=True)
                oh = jnp.dot(p.astype(bf16), vh,
                             preferred_element_type=jnp.float32)       # (S, Dh)
                # ".view(B,S,E)" re-layout, no perm matmul / concatenates:
                # head h owns view rows [h*G, (h+1)*G); its lane chunk jb holds
                # attention rows jb, jb+H, jb+2H, ...  Stage oh in VMEM, then do
                # static strided reads + contiguous slice stores.
                oh_scr[...] = oh
                for jb in range(H):
                    view_scr[r0 + h * G:r0 + (h + 1) * G,
                             jb * Dh:(jb + 1) * Dh] = (
                        oh_scr[pl.ds(jb, G, stride=H), :])

        # concat projection (+ attn_dropout = identity in eval mode)
        attn_view = view_scr[...]                                      # (R, E) f32
        y = jnp.dot(attn_view.astype(bf16), wp_ref[...],
                    preferred_element_type=jnp.float32) + bp_ref[...]
        if add_norm:
            y = y + x_bf.astype(jnp.float32)
            mean = jnp.mean(y, axis=-1, keepdims=True)
            var = jnp.mean((y - mean) ** 2, axis=-1, keepdims=True)
            y = (y - mean) * lax.rsqrt(var + eps) * g_ref[...] + b_ref[...]
        y_scr[...] = y

    # ---- feed-forward, K-tiled over the inner grid axis ---------------------
    # ff: Linear -> ReLU -> (Dropout) -> Linear -> (Dropout); per-chunk ReLU is
    # exact because ReLU is element-wise over the ff_dim columns of this chunk.
    y = y_scr[...]
    h1 = jnp.dot(y.astype(bf16), w1_ref[...],
                 preferred_element_type=jnp.float32) + b1_ref[...]
    h1 = jnp.maximum(h1, 0.0)
    partial = jnp.dot(h1.astype(bf16), w2_ref[...],
                      preferred_element_type=jnp.float32)

    @pl.when(f == 0)
    def _init_out():
        o_ref[...] = (partial + b2_ref[...]).astype(o_ref.dtype)

    @pl.when(f != 0)
    def _acc_out():
        o_ref[...] += partial.astype(o_ref.dtype)


# ----------------------------------------------------------------------------
# Wrapper helpers
# ----------------------------------------------------------------------------
def _device_hints():
    """Best-effort (dual_tensorcore_chip, physical_vmem_bytes)."""
    try:
        kind = jax.devices()[0].device_kind.lower()
    except Exception:
        kind = ""
    dual_tc = "v7" in kind          # v7x: two TensorCores -> prefer an even grid
    try:
        phys_vmem = int(pltpu.get_tpu_info().vmem_capacity_bytes)
    except Exception:
        phys_vmem = 64 * 2 ** 20    # conservative default (v7x per-TC VMEM)
    return dual_tc, phys_vmem


def _pick_batch_per_step(batch, seq_len, *, target_rows, prefer_even_grid):
    """Largest divisor of `batch` whose row block fits `target_rows`; on dual-TC
    chips prefer an even grid length so both TensorCores get equal work."""
    divisors = [d for d in range(1, batch + 1) if batch % d == 0]
    legal = [d for d in divisors if (d * seq_len) % 8 == 0 or d == batch]
    fits = [d for d in legal if d * seq_len <= target_rows] or [min(legal)]
    if prefer_even_grid:
        even = [d for d in fits if (batch // d) % 2 == 0]
        if even:
            return max(even)
    return max(fits)


def _pick_ff_tile(ff_dim, target=2048):
    """FFN K-tile: whole ff_dim if small, else the largest 128-multiple divisor
    <= target (keeps w1/w2 blocks lane/sublane aligned)."""
    if ff_dim <= target:
        return ff_dim
    cands = [d for d in range(128, target + 1, 128) if ff_dim % d == 0]
    return max(cands) if cands else ff_dim


# ----------------------------------------------------------------------------
# Wrapper
# ----------------------------------------------------------------------------
def encoder_attention_block(x, params, *, num_heads, add_norm=True):
    B, S, E = x.shape
    assert E % num_heads == 0
    if S % num_heads != 0:
        # TODO(synk): seq_len % num_heads != 0 needs a gather-based shuffle for
        # the module's contiguous .view(B, S, E); not implemented.
        raise NotImplementedError("seq_len must be a multiple of num_heads")
    Dh = E // num_heads
    F = params["w1"].shape[0]
    scale = 1.0 / float(E) ** 0.5
    bf16, f32 = jnp.bfloat16, jnp.float32

    # --- plain-JAX parameter plumbing: lane-dense layouts, bf16 MXU weights --
    wqkv_t = params["wqkv"].T.astype(bf16)           # (E, 3E)
    bqkv = params["bqkv"].reshape(1, 3 * E).astype(f32)
    wp_t = params["wproj"].T.astype(bf16)            # (E, E)
    bp = params["bproj"].reshape(1, E).astype(f32)
    gamma = params["gamma"].reshape(1, E).astype(f32)
    beta = params["beta"].reshape(1, E).astype(f32)
    w1_t = params["w1"].T.astype(bf16)               # (E, F)
    b1 = params["b1"].reshape(1, F).astype(f32)
    w2_t = params["w2"].T.astype(bf16)               # (F, E)
    b2 = params["b2"].reshape(1, E).astype(f32)

    # --- generation-aware block / tile sizing --------------------------------
    dual_tc, phys_vmem = _device_hints()
    # crude per-row activation budget (qkv value + scratches + in/out blocks)
    rows_cap = max(S, phys_vmem // (32 * E * 4))
    target_rows = min(1024 if dual_tc else 2048, rows_cap)
    bt = _pick_batch_per_step(B, S, target_rows=target_rows,
                              prefer_even_grid=dual_tc)
    rows = bt * S
    ft = _pick_ff_tile(F)
    grid = (B // bt, F // ft)

    x_flat = x.reshape(B * S, E).astype(bf16)        # bf16 input: halves DMA bytes

    # NOTE: ideally Dh is a multiple of 128 and G=S/H a multiple of 8 so the
    # per-head slices / view stores are unmasked; padding is not possible here
    # without changing the module's contiguous-.view semantics, so misaligned
    # (toy) shapes simply run with masked partial stores.

    def const_spec(arr):
        nd = arr.ndim
        # constant-index operands: single-buffered (index map is always block 0)
        return pl.BlockSpec(arr.shape, lambda i, f: (0,) * nd,
                            pipeline_mode=pl.Buffered(1))

    kernel = functools.partial(
        _fused_encoder_attention_kernel,
        num_heads=num_heads, seq_len=S, batch_per_step=bt,
        scale=scale, add_norm=add_norm, eps=1e-5)

    # explicit scoped-VMEM limit: single-buffered bf16 attention weights +
    # double-buffered FFN tiles + activation block, 2x headroom, clamped to
    # the physical per-core VMEM.
    const_bytes = (E * 3 * E + E * E) * 2 + (3 * E + 4 * E) * 4
    ffn_bytes = 2 * ((E * ft + ft * E) * 2 + ft * 4)
    act_bytes = rows * (2 * E * 2 + 2 * E * 4 + 2 * E * 4 + 3 * E * 4) + S * Dh * 4
    vmem_limit = int(min(max(32 * 2 ** 20,
                             2 * (const_bytes + ffn_bytes + act_bytes)),
                         phys_vmem))

    out_flat = pl.pallas_call(
        kernel,
        out_shape=jax.ShapeDtypeStruct((B * S, E), f32),
        grid=grid,
        in_specs=[
            pl.BlockSpec((rows, E), lambda i, f: (i, 0)),      # x row block
            const_spec(wqkv_t), const_spec(bqkv),
            const_spec(wp_t), const_spec(bp),
            const_spec(gamma), const_spec(beta),
            pl.BlockSpec((E, ft), lambda i, f: (0, f)),        # w1 K-chunk
            pl.BlockSpec((1, ft), lambda i, f: (0, f)),        # b1 K-chunk
            pl.BlockSpec((ft, E), lambda i, f: (f, 0)),        # w2 K-chunk
            const_spec(b2),
        ],
        out_specs=pl.BlockSpec((rows, E), lambda i, f: (i, 0)),
        scratch_shapes=[
            pltpu.VMEM((rows, E), f32),     # attn ".view" assembly
            pltpu.VMEM((rows, E), f32),     # post-LN y (lives across FFN K-steps)
            pltpu.VMEM((S, Dh), f32),       # per-head staging for the re-layout
        ],
        compiler_params=pltpu.CompilerParams(
            dimension_semantics=("parallel", "arbitrary"),
            vmem_limit_bytes=vmem_limit),
    )(x_flat, wqkv_t, bqkv, wp_t, bp, gamma, beta, w1_t, b1, w2_t, b2)

    return out_flat.reshape(B, S, E)


# ----------------------------------------------------------------------------
# Pure-JAX reference (mirrors the PyTorch forward; emulates the kernel's
# bf16-operand / f32-accumulation matmuls so tolerances stay tight)
# ----------------------------------------------------------------------------
def reference_forward(x, params, *, num_heads, add_norm=True,
                      mxu_dtype=jnp.bfloat16):
    f32 = jnp.float32

    def mm(a, b):
        return jnp.matmul(a.astype(mxu_dtype), b.astype(mxu_dtype),
                          preferred_element_type=f32)

    B, S, E = x.shape
    Dh = E // num_heads
    x = x.astype(f32)
    qkv = mm(x, params["wqkv"].T) + params["bqkv"]
    qkv = qkv.reshape(B, S, 3, num_heads, Dh).transpose(0, 2, 3, 1, 4)
    Q, K, V = qkv[:, 0], qkv[:, 1], qkv[:, 2]
    A = mm(Q, jnp.swapaxes(K, -1, -2)) / (E ** 0.5)
    A = jax.nn.softmax(A, axis=-1)
    attn = mm(A, V)                            # (B, H, S, Dh)
    attn = attn.reshape(B, S, E)               # same contiguous "view" as the module
    attn = mm(attn, params["wproj"].T) + params["bproj"]
    if add_norm:
        y = attn + x
        mean = y.mean(-1, keepdims=True)
        var = ((y - mean) ** 2).mean(-1, keepdims=True)
        y = (y - mean) / jnp.sqrt(var + 1e-5) * params["gamma"] + params["beta"]
    else:
        y = attn
    h = jnp.maximum(mm(y, params["w1"].T) + params["b1"], 0.0)
    return mm(h, params["w2"].T) + params["b2"]


# ----------------------------------------------------------------------------
if __name__ == "__main__":
    B, S, E, H, FF = 2, 8, 32, 4, 64

    key = jax.random.PRNGKey(0)
    ks = jax.random.split(key, 11)
    f32 = jnp.float32
    params = {
        "wqkv": 0.1 * jax.random.normal(ks[0], (3 * E, E), f32),
        "bqkv": 0.1 * jax.random.normal(ks[1], (3 * E,), f32),
        "wproj": 0.1 * jax.random.normal(ks[2], (E, E), f32),
        "bproj": 0.1 * jax.random.normal(ks[3], (E,), f32),
        "gamma": 1.0 + 0.1 * jax.random.normal(ks[4], (E,), f32),
        "beta": 0.1 * jax.random.normal(ks[5], (E,), f32),
        "w1": 0.1 * jax.random.normal(ks[6], (FF, E), f32),
        "b1": 0.1 * jax.random.normal(ks[7], (FF,), f32),
        "w2": 0.1 * jax.random.normal(ks[8], (E, FF), f32),
        "b2": 0.1 * jax.random.normal(ks[9], (E,), f32),
    }
    x = jax.random.normal(ks[10], (B, S, E), f32)
    # Round the input to bf16 once so kernel and reference see identical values
    # (the kernel feeds the MXU bf16 operands).
    x = x.astype(jnp.bfloat16).astype(f32)

    out = encoder_attention_block(x, params, num_heads=H, add_norm=True)
    out = jax.block_until_ready(out)

    ref = reference_forward(x, params, num_heads=H, add_norm=True)
    assert out.shape == (B, S, E)
    # tolerance covers the approximate (EUP) softmax reciprocal and matmul
    # accumulation-order differences (operands are bf16-rounded in both paths)
    err = jnp.max(jnp.abs(out - ref))
    assert jnp.allclose(out, ref, atol=5e-3, rtol=5e-3), f"max abs err {err}"

    print("KERNEL_OK")
</pallas_src>

<mosaic_0001>
module attributes {stable_mosaic.version = 11 : i64} {
  func.func @_fused_encoder_attention_kernel(%arg0: i32, %arg1: i32, %arg2: memref<16x32xbf16, #tpu.memory_space<vmem>>, %arg3: memref<32x96xbf16, #tpu.memory_space<vmem>>, %arg4: memref<1x96xf32, #tpu.memory_space<vmem>>, %arg5: memref<32x32xbf16, #tpu.memory_space<vmem>>, %arg6: memref<1x32xf32, #tpu.memory_space<vmem>>, %arg7: memref<1x32xf32, #tpu.memory_space<vmem>>, %arg8: memref<1x32xf32, #tpu.memory_space<vmem>>, %arg9: memref<32x64xbf16, #tpu.memory_space<vmem>>, %arg10: memref<1x64xf32, #tpu.memory_space<vmem>>, %arg11: memref<64x32xbf16, #tpu.memory_space<vmem>>, %arg12: memref<1x32xf32, #tpu.memory_space<vmem>>, %arg13: memref<16x32xf32, #tpu.memory_space<vmem>>, %arg14: memref<16x32xf32, #tpu.memory_space<vmem>>, %arg15: memref<16x32xf32, #tpu.memory_space<vmem>>, %arg16: memref<8x8xf32, #tpu.memory_space<vmem>>) attributes {dimension_semantics = [#tpu.dimension_semantics<parallel>, #tpu.dimension_semantics<arbitrary>], iteration_bounds = array<i64: 1, 1>, scalar_prefetch = 0 : i64, scratch_operands = 3 : i64, tpu.core_type = #tpu.core_type<tc>, window_params = [{transform_indices = @transform_0, window_bounds = array<i64: 16, 32>}, {pipeline_mode = #tpu.pipeline_mode<synchronous>, transform_indices = @transform_1, window_bounds = array<i64: 32, 96>}, {pipeline_mode = #tpu.pipeline_mode<synchronous>, transform_indices = @transform_2, window_bounds = array<i64: 1, 96>}, {pipeline_mode = #tpu.pipeline_mode<synchronous>, transform_indices = @transform_3, window_bounds = array<i64: 32, 32>}, {pipeline_mode = #tpu.pipeline_mode<synchronous>, transform_indices = @transform_4, window_bounds = array<i64: 1, 32>}, {pipeline_mode = #tpu.pipeline_mode<synchronous>, transform_indices = @transform_5, window_bounds = array<i64: 1, 32>}, {pipeline_mode = #tpu.pipeline_mode<synchronous>, transform_indices = @transform_6, window_bounds = array<i64: 1, 32>}, {transform_indices = @transform_7, window_bounds = array<i64: 32, 64>}, {transform_indices = @transform_8, window_bounds = array<i64: 1, 64>}, {transform_indices = @transform_9, window_bounds = array<i64: 64, 32>}, {pipeline_mode = #tpu.pipeline_mode<synchronous>, transform_indices = @transform_10, window_bounds = array<i64: 1, 32>}, {transform_indices = @transform_11, window_bounds = array<i64: 16, 32>}]} {
    %c0_i32 = arith.constant 0 : i32
    %0 = arith.cmpi eq, %arg1, %c0_i32 : i32
    %1 = arith.extui %0 : i1 to i32
    %c0_i32_0 = arith.constant 0 : i32
    %2 = arith.cmpi ne, %1, %c0_i32_0 : i32
    scf.if %2 {
      %c0_14 = arith.constant 0 : index
      %c0_15 = arith.constant 0 : index
      %21 = vector.load %arg2[%c0_14, %c0_15] : memref<16x32xbf16, #tpu.memory_space<vmem>>, vector<16x32xbf16>
      %c0_16 = arith.constant 0 : index
      %c0_17 = arith.constant 0 : index
      %22 = vector.load %arg3[%c0_16, %c0_17] : memref<32x96xbf16, #tpu.memory_space<vmem>>, vector<32x96xbf16>
      %cst_18 = arith.constant dense<0.000000e+00> : vector<16x96xf32>
      %23 = tpu.matmul %21, %22, %cst_18 {dimension_numbers = #tpu.dot_dimension_numbers<[1], [0], [0], [1], [0, 0, 1, 1], [], []>} : vector<16x32xbf16>, vector<32x96xbf16>, vector<16x96xf32> -> vector<16x96xf32>
      %c0_19 = arith.constant 0 : index
      %c0_20 = arith.constant 0 : index
      %24 = vector.load %arg4[%c0_19, %c0_20] : memref<1x96xf32, #tpu.memory_space<vmem>>, vector<1x96xf32>
      %25 = vector.broadcast %24 : vector<1x96xf32> to vector<16x96xf32>
      %26 = arith.addf %23, %25 : vector<16x96xf32>
      %27 = vector.extract_strided_slice %26 {offsets = [0, 0], sizes = [8, 96], strides = [1, 1]} : vector<16x96xf32> to vector<8x96xf32>
      %28 = vector.extract_strided_slice %27 {offsets = [0, 0], sizes = [8, 8], strides = [1, 1]} : vector<8x96xf32> to vector<8x8xf32>
      %29 = arith.truncf %28 : vector<8x8xf32> to vector<8x8xbf16>
      %30 = vector.extract_strided_slice %27 {offsets = [0, 32], sizes = [8, 8], strides = [1, 1]} : vector<8x96xf32> to vector<8x8xf32>
      %31 = arith.truncf %30 : vector<8x8xf32> to vector<8x8xbf16>
      %32 = vector.extract_strided_slice %27 {offsets = [0, 64], sizes = [8, 8], strides = [1, 1]} : vector<8x96xf32> to vector<8x8xf32>
      %33 = arith.truncf %32 : vector<8x8xf32> to vector<8x8xbf16>
      %cst_21 = arith.constant dense<0.000000e+00> : vector<8x8xf32>
      %34 = tpu.matmul %29, %31, %cst_21 {dimension_numbers = #tpu.dot_dimension_numbers<[1], [1], [0], [0], [0, 0, 1, 0], [], []>} : vector<8x8xbf16>, vector<8x8xbf16>, vector<8x8xf32> -> vector<8x8xf32>
      %cst_22 = arith.constant 0.176776692 : f32
      %35 = vector.broadcast %cst_22 : f32 to vector<8x8xf32>
      %36 = arith.mulf %34, %35 : vector<8x8xf32>
      %cst_23 = arith.constant dense<0xFF800000> : vector<8xf32>
      %37 = vector.multi_reduction <maximumf>, %36, %cst_23 [1] : vector<8x8xf32> to vector<8xf32>
      %38 = vector.shape_cast %37 : vector<8xf32> to vector<8x1xf32>
      %39 = vector.broadcast %38 : vector<8x1xf32> to vector<8x8xf32>
      %40 = arith.subf %36, %39 : vector<8x8xf32>
      %41 = math.exp %40 : vector<8x8xf32>
      %cst_24 = arith.constant dense<0.000000e+00> : vector<8xf32>
      %42 = vector.multi_reduction <add>, %41, %cst_24 [1] : vector<8x8xf32> to vector<8xf32>
      %43 = vector.shape_cast %42 : vector<8xf32> to vector<8x1xf32>
      %44 = tpu.reciprocal %43 {approx = true} : vector<8x1xf32> -> vector<8x1xf32>
      %45 = vector.broadcast %44 : vector<8x1xf32> to vector<8x8xf32>
      %46 = arith.mulf %41, %45 : vector<8x8xf32>
      %47 = arith.truncf %46 : vector<8x8xf32> to vector<8x8xbf16>
      %cst_25 = arith.constant dense<0.000000e+00> : vector<8x8xf32>
      %48 = tpu.matmul %47, %33, %cst_25 {dimension_numbers = #tpu.dot_dimension_numbers<[1], [0], [0], [1], [0, 0, 1, 1], [], []>} : vector<8x8xbf16>, vector<8x8xbf16>, vector<8x8xf32> -> vector<8x8xf32>
      %c0_26 = arith.constant 0 : index
      %c0_27 = arith.constant 0 : index
      %49 = vector.load %arg16[%c0_26, %c0_27] : memref<8x8xf32, #tpu.memory_space<vmem>>, vector<8x8xf32>
      tpu.vector_store %arg16[%c0_26, %c0_27], %48 {strides = array<i32>} : memref<8x8xf32, #tpu.memory_space<vmem>>, vector<8x8xf32>,
      %c0_28 = arith.constant 0 : index
      %c0_29 = arith.constant 0 : index
      %50 = tpu.strided_load %arg16[%c0_28, %c0_29] {strides = array<i32: 4, 1>} : memref<8x8xf32, #tpu.memory_space<vmem>>, vector<2x8xf32>
      %c0_30 = arith.constant 0 : index
      %c0_31 = arith.constant 0 : index
      %51 = vector.load %arg14[%c0_30, %c0_31] : memref<16x32xf32, #tpu.memory_space<vmem>>, vector<2x8xf32>
      tpu.vector_store %arg14[%c0_30, %c0_31], %50 {strides = array<i32>} : memref<16x32xf32, #tpu.memory_space<vmem>>, vector<2x8xf32>,
      %c1 = arith.constant 1 : index
      %c0_32 = arith.constant 0 : index
      %52 = tpu.strided_load %arg16[%c1, %c0_32] {strides = array<i32: 4, 1>} : memref<8x8xf32, #tpu.memory_space<vmem>>, vector<2x8xf32>
      %c0_33 = arith.constant 0 : index
      %c8 = arith.constant 8 : index
      %53 = vector.load %arg14[%c0_33, %c8] : memref<16x32xf32, #tpu.memory_space<vmem>>, vector<2x8xf32>
      tpu.vector_store %arg14[%c0_33, %c8], %52 {strides = array<i32>} : memref<16x32xf32, #tpu.memory_space<vmem>>, vector<2x8xf32>,
      %c2 = arith.constant 2 : index
      %c0_34 = arith.constant 0 : index
      %54 = tpu.strided_load %arg16[%c2, %c0_34] {strides = array<i32: 4, 1>} : memref<8x8xf32, #tpu.memory_space<vmem>>, vector<2x8xf32>
      %c0_35 = arith.constant 0 : index
      %c16 = arith.constant 16 : index
      %55 = vector.load %arg14[%c0_35, %c16] : memref<16x32xf32, #tpu.memory_space<vmem>>, vector<2x8xf32>
      tpu.vector_store %arg14[%c0_35, %c16], %54 {strides = array<i32>} : memref<16x32xf32, #tpu.memory_space<vmem>>, vector<2x8xf32>,
      %c3 = arith.constant 3 : index
      %c0_36 = arith.constant 0 : index
      %56 = tpu.strided_load %arg16[%c3, %c0_36] {strides = array<i32: 4, 1>} : memref<8x8xf32, #tpu.memory_space<vmem>>, vector<2x8xf32>
      %c0_37 = arith.constant 0 : index
      %c24 = arith.constant 24 : index
      %57 = vector.load %arg14[%c0_37, %c24] : memref<16x32xf32, #tpu.memory_space<vmem>>, vector<2x8xf32>
      tpu.vector_store %arg14[%c0_37, %c24], %56 {strides = array<i32>} : memref<16x32xf32, #tpu.memory_space<vmem>>, vector<2x8xf32>,
      %58 = vector.extract_strided_slice %27 {offsets = [0, 8], sizes = [8, 8], strides = [1, 1]} : vector<8x96xf32> to vector<8x8xf32>
      %59 = arith.truncf %58 : vector<8x8xf32> to vector<8x8xbf16>
      %60 = vector.extract_strided_slice %27 {offsets = [0, 40], sizes = [8, 8], strides = [1, 1]} : vector<8x96xf32> to vector<8x8xf32>
      %61 = arith.truncf %60 : vector<8x8xf32> to vector<8x8xbf16>
      %62 = vector.extract_strided_slice %27 {offsets = [0, 72], sizes = [8, 8], strides = [1, 1]} : vector<8x96xf32> to vector<8x8xf32>
      %63 = arith.truncf %62 : vector<8x8xf32> to vector<8x8xbf16>
      %cst_38 = arith.constant dense<0.000000e+00> : vector<8x8xf32>
      %64 = tpu.matmul %59, %61, %cst_38 {dimension_numbers = #tpu.dot_dimension_numbers<[1], [1], [0], [0], [0, 0, 1, 0], [], []>} : vector<8x8xbf16>, vector<8x8xbf16>, vector<8x8xf32> -> vector<8x8xf32>
      %cst_39 = arith.constant 0.176776692 : f32
      %65 = vector.broadcast %cst_39 : f32 to vector<8x8xf32>
      %66 = arith.mulf %64, %65 : vector<8x8xf32>
      %cst_40 = arith.constant dense<0xFF800000> : vector<8xf32>
      %67 = vector.multi_reduction <maximumf>, %66, %cst_40 [1] : vector<8x8xf32> to vector<8xf32>
      %68 = vector.shape_cast %67 : vector<8xf32> to vector<8x1xf32>
      %69 = vector.broadcast %68 : vector<8x1xf32> to vector<8x8xf32>
      %70 = arith.subf %66, %69 : vector<8x8xf32>
      %71 = math.exp %70 : vector<8x8xf32>
      %cst_41 = arith.constant dense<0.000000e+00> : vector<8xf32>
      %72 = vector.multi_reduction <add>, %71, %cst_41 [1] : vector<8x8xf32> to vector<8xf32>
      %73 = vector.shape_cast %72 : vector<8xf32> to vector<8x1xf32>
      %74 = tpu.reciprocal %73 {approx = true} : vector<8x1xf32> -> vector<8x1xf32>
      %75 = vector.broadcast %74 : vector<8x1xf32> to vector<8x8xf32>
      %76 = arith.mulf %71, %75 : vector<8x8xf32>
      %77 = arith.truncf %76 : vector<8x8xf32> to vector<8x8xbf16>
      %cst_42 = arith.constant dense<0.000000e+00> : vector<8x8xf32>
      %78 = tpu.matmul %77, %63, %cst_42 {dimension_numbers = #tpu.dot_dimension_numbers<[1], [0], [0], [1], [0, 0, 1, 1], [], []>} : vector<8x8xbf16>, vector<8x8xbf16>, vector<8x8xf32> -> vector<8x8xf32>
      %c0_43 = arith.constant 0 : index
      %c0_44 = arith.constant 0 : index
      %79 = vector.load %arg16[%c0_43, %c0_44] : memref<8x8xf32, #tpu.memory_space<vmem>>, vector<8x8xf32>
      tpu.vector_store %arg16[%c0_43, %c0_44], %78 {strides = array<i32>} : memref<8x8xf32, #tpu.memory_space<vmem>>, vector<8x8xf32>,
      %c0_45 = arith.constant 0 : index
      %c0_46 = arith.constant 0 : index
      %80 = tpu.strided_load %arg16[%c0_45, %c0_46] {strides = array<i32: 4, 1>} : memref<8x8xf32, #tpu.memory_space<vmem>>, vector<2x8xf32>
      %c2_47 = arith.constant 2 : index
      %c0_48 = arith.constant 0 : index
      %81 = vector.load %arg14[%c2_47, %c0_48] : memref<16x32xf32, #tpu.memory_space<vmem>>, vector<2x8xf32>
      tpu.vector_store %arg14[%c2_47, %c0_48], %80 {strides = array<i32>} : memref<16x32xf32, #tpu.memory_space<vmem>>, vector<2x8xf32>,
      %c1_49 = arith.constant 1 : index
      %c0_50 = arith.constant 0 : index
      %82 = tpu.strided_load %arg16[%c1_49, %c0_50] {strides = array<i32: 4, 1>} : memref<8x8xf32, #tpu.memory_space<vmem>>, vector<2x8xf32>
      %c2_51 = arith.constant 2 : index
      %c8_52 = arith.constant 8 : index
      %83 = vector.load %arg14[%c2_51, %c8_52] : memref<16x32xf32, #tpu.memory_space<vmem>>, vector<2x8xf32>
      tpu.vector_store %arg14[%c2_51, %c8_52], %82 {strides = array<i32>} : memref<16x32xf32, #tpu.memory_space<vmem>>, vector<2x8xf32>,
      %c2_53 = arith.constant 2 : index
      %c0_54 = arith.constant 0 : index
      %84 = tpu.strided_load %arg16[%c2_53, %c0_54] {strides = array<i32: 4, 1>} : memref<8x8xf32, #tpu.memory_space<vmem>>, vector<2x8xf32>
      %c2_55 = arith.constant 2 : index
      %c16_56 = arith.constant 16 : index
      %85 = vector.load %arg14[%c2_55, %c16_56] : memref<16x32xf32, #tpu.memory_space<vmem>>, vector<2x8xf32>
      tpu.vector_store %arg14[%c2_55, %c16_56], %84 {strides = array<i32>} : memref<16x32xf32, #tpu.memory_space<vmem>>, vector<2x8xf32>,
      %c3_57 = arith.constant 3 : index
      %c0_58 = arith.constant 0 : index
      %86 = tpu.strided_load %arg16[%c3_57, %c0_58] {strides = array<i32: 4, 1>} : memref<8x8xf32, #tpu.memory_space<vmem>>, vector<2x8xf32>
      %c2_59 = arith.constant 2 : index
      %c24_60 = arith.constant 24 : index
      %87 = vector.load %arg14[%c2_59, %c24_60] : memref<16x32xf32, #tpu.memory_space<vmem>>, vector<2x8xf32>
      tpu.vector_store %arg14[%c2_59, %c24_60], %86 {strides = array<i32>} : memref<16x32xf32, #tpu.memory_space<vmem>>, vector<2x8xf32>,
      %88 = vector.extract_strided_slice %27 {offsets = [0, 16], sizes = [8, 8], strides = [1, 1]} : vector<8x96xf32> to vector<8x8xf32>
      %89 = arith.truncf %88 : vector<8x8xf32> to vector<8x8xbf16>
      %90 = vector.extract_strided_slice %27 {offsets = [0, 48], sizes = [8, 8], strides = [1, 1]} : vector<8x96xf32> to vector<8x8xf32>
      %91 = arith.truncf %90 : vector<8x8xf32> to vector<8x8xbf16>
      %92 = vector.extract_strided_slice %27 {offsets = [0, 80], sizes = [8, 8], strides = [1, 1]} : vector<8x96xf32> to vector<8x8xf32>
      %93 = arith.truncf %92 : vector<8x8xf32> to vector<8x8xbf16>
      %cst_61 = arith.constant dense<0.000000e+00> : vector<8x8xf32>
      %94 = tpu.matmul %89, %91, %cst_61 {dimension_numbers = #tpu.dot_dimension_numbers<[1], [1], [0], [0], [0, 0, 1, 0], [], []>} : vector<8x8xbf16>, vector<8x8xbf16>, vector<8x8xf32> -> vector<8x8xf32>
      %cst_62 = arith.constant 0.176776692 : f32
      %95 = vector.broadcast %cst_62 : f32 to vector<8x8xf32>
      %96 = arith.mulf %94, %95 : vector<8x8xf32>
      %cst_63 = arith.constant dense<0xFF800000> : vector<8xf32>
      %97 = vector.multi_reduction <maximumf>, %96, %cst_63 [1] : vector<8x8xf32> to vector<8xf32>
      %98 = vector.shape_cast %97 : vector<8xf32> to vector<8x1xf32>
      %99 = vector.broadcast %98 : vector<8x1xf32> to vector<8x8xf32>
      %100 = arith.subf %96, %99 : vector<8x8xf32>
      %101 = math.exp %100 : vector<8x8xf32>
      %cst_64 = arith.constant dense<0.000000e+00> : vector<8xf32>
      %102 = vector.multi_reduction <add>, %101, %cst_64 [1] : vector<8x8xf32> to vector<8xf32>
      %103 = vector.shape_cast %102 : vector<8xf32> to vector<8x1xf32>
      %104 = tpu.reciprocal %103 {approx = true} : vector<8x1xf32> -> vector<8x1xf32>
      %105 = vector.broadcast %104 : vector<8x1xf32> to vector<8x8xf32>
      %106 = arith.mulf %101, %105 : vector<8x8xf32>
      %107 = arith.truncf %106 : vector<8x8xf32> to vector<8x8xbf16>
      %cst_65 = arith.constant dense<0.000000e+00> : vector<8x8xf32>
      %108 = tpu.matmul %107, %93, %cst_65 {dimension_numbers = #tpu.dot_dimension_numbers<[1], [0], [0], [1], [0, 0, 1, 1], [], []>} : vector<8x8xbf16>, vector<8x8xbf16>, vector<8x8xf32> -> vector<8x8xf32>
      %c0_66 = arith.constant 0 : index
      %c0_67 = arith.constant 0 : index
      %109 = vector.load %arg16[%c0_66, %c0_67] : memref<8x8xf32, #tpu.memory_space<vmem>>, vector<8x8xf32>
      tpu.vector_store %arg16[%c0_66, %c0_67], %108 {strides = array<i32>} : memref<8x8xf32, #tpu.memory_space<vmem>>, vector<8x8xf32>,
      %c0_68 = arith.constant 0 : index
      %c0_69 = arith.constant 0 : index
      %110 = tpu.strided_load %arg16[%c0_68, %c0_69] {strides = array<i32: 4, 1>} : memref<8x8xf32, #tpu.memory_space<vmem>>, vector<2x8xf32>
      %c4 = arith.constant 4 : index
      %c0_70 = arith.constant 0 : index
      %111 = vector.load %arg14[%c4, %c0_70] : memref<16x32xf32, #tpu.memory_space<vmem>>, vector<2x8xf32>
      tpu.vector_store %arg14[%c4, %c0_70], %110 {strides = array<i32>} : memref<16x32xf32, #tpu.memory_space<vmem>>, vector<2x8xf32>,
      %c1_71 = arith.constant 1 : index
      %c0_72 = arith.constant 0 : index
      %112 = tpu.strided_load %arg16[%c1_71, %c0_72] {strides = array<i32: 4, 1>} : memref<8x8xf32, #tpu.memory_space<vmem>>, vector<2x8xf32>
      %c4_73 = arith.constant 4 : index
      %c8_74 = arith.constant 8 : index
      %113 = vector.load %arg14[%c4_73, %c8_74] : memref<16x32xf32, #tpu.memory_space<vmem>>, vector<2x8xf32>
      tpu.vector_store %arg14[%c4_73, %c8_74], %112 {strides = array<i32>} : memref<16x32xf32, #tpu.memory_space<vmem>>, vector<2x8xf32>,
      %c2_75 = arith.constant 2 : index
      %c0_76 = arith.constant 0 : index
      %114 = tpu.strided_load %arg16[%c2_75, %c0_76] {strides = array<i32: 4, 1>} : memref<8x8xf32, #tpu.memory_space<vmem>>, vector<2x8xf32>
      %c4_77 = arith.constant 4 : index
      %c16_78 = arith.constant 16 : index
      %115 = vector.load %arg14[%c4_77, %c16_78] : memref<16x32xf32, #tpu.memory_space<vmem>>, vector<2x8xf32>
      tpu.vector_store %arg14[%c4_77, %c16_78], %114 {strides = array<i32>} : memref<16x32xf32, #tpu.memory_space<vmem>>, vector<2x8xf32>,
      %c3_79 = arith.constant 3 : index
      %c0_80 = arith.constant 0 : index
      %116 = tpu.strided_load %arg16[%c3_79, %c0_80] {strides = array<i32: 4, 1>} : memref<8x8xf32, #tpu.memory_space<vmem>>, vector<2x8xf32>
      %c4_81 = arith.constant 4 : index
      %c24_82 = arith.constant 24 : index
      %117 = vector.load %arg14[%c4_81, %c24_82] : memref<16x32xf32, #tpu.memory_space<vmem>>, vector<2x8xf32>
      tpu.vector_store %arg14[%c4_81, %c24_82], %116 {strides = array<i32>} : memref<16x32xf32, #tpu.memory_space<vmem>>, vector<2x8xf32>,
      %118 = vector.extract_strided_slice %27 {offsets = [0, 24], sizes = [8, 8], strides = [1, 1]} : vector<8x96xf32> to vector<8x8xf32>
      %119 = arith.truncf %118 : vector<8x8xf32> to vector<8x8xbf16>
      %120 = vector.extract_strided_slice %27 {offsets = [0, 56], sizes = [8, 8], strides = [1, 1]} : vector<8x96xf32> to vector<8x8xf32>
      %121 = arith.truncf %120 : vector<8x8xf32> to vector<8x8xbf16>
      %122 = vector.extract_strided_slice %27 {offsets = [0, 88], sizes = [8, 8], strides = [1, 1]} : vector<8x96xf32> to vector<8x8xf32>
      %123 = arith.truncf %122 : vector<8x8xf32> to vector<8x8xbf16>
      %cst_83 = arith.constant dense<0.000000e+00> : vector<8x8xf32>
      %124 = tpu.matmul %119, %121, %cst_83 {dimension_numbers = #tpu.dot_dimension_numbers<[1], [1], [0], [0], [0, 0, 1, 0], [], []>} : vector<8x8xbf16>, vector<8x8xbf16>, vector<8x8xf32> -> vector<8x8xf32>
      %cst_84 = arith.constant 0.176776692 : f32
      %125 = vector.broadcast %cst_84 : f32 to vector<8x8xf32>
      %126 = arith.mulf %124, %125 : vector<8x8xf32>
      %cst_85 = arith.constant dense<0xFF800000> : vector<8xf32>
      %127 = vector.multi_reduction <maximumf>, %126, %cst_85 [1] : vector<8x8xf32> to vector<8xf32>
      %128 = vector.shape_cast %127 : vector<8xf32> to vector<8x1xf32>
      %129 = vector.broadcast %128 : vector<8x1xf32> to vector<8x8xf32>
      %130 = arith.subf %126, %129 : vector<8x8xf32>
      %131 = math.exp %130 : vector<8x8xf32>
      %cst_86 = arith.constant dense<0.000000e+00> : vector<8xf32>
      %132 = vector.multi_reduction <add>, %131, %cst_86 [1] : vector<8x8xf32> to vector<8xf32>
      %133 = vector.shape_cast %132 : vector<8xf32> to vector<8x1xf32>
      %134 = tpu.reciprocal %133 {approx = true} : vector<8x1xf32> -> vector<8x1xf32>
      %135 = vector.broadcast %134 : vector<8x1xf32> to vector<8x8xf32>
      %136 = arith.mulf %131, %135 : vector<8x8xf32>
      %137 = arith.truncf %136 : vector<8x8xf32> to vector<8x8xbf16>
      %cst_87 = arith.constant dense<0.000000e+00> : vector<8x8xf32>
      %138 = tpu.matmul %137, %123, %cst_87 {dimension_numbers = #tpu.dot_dimension_numbers<[1], [0], [0], [1], [0, 0, 1, 1], [], []>} : vector<8x8xbf16>, vector<8x8xbf16>, vector<8x8xf32> -> vector<8x8xf32>
      %c0_88 = arith.constant 0 : index
      %c0_89 = arith.constant 0 : index
      %139 = vector.load %arg16[%c0_88, %c0_89] : memref<8x8xf32, #tpu.memory_space<vmem>>, vector<8x8xf32>
      tpu.vector_store %arg16[%c0_88, %c0_89], %138 {strides = array<i32>} : memref<8x8xf32, #tpu.memory_space<vmem>>, vector<8x8xf32>,
      %c0_90 = arith.constant 0 : index
      %c0_91 = arith.constant 0 : index
      %140 = tpu.strided_load %arg16[%c0_90, %c0_91] {strides = array<i32: 4, 1>} : memref<8x8xf32, #tpu.memory_space<vmem>>, vector<2x8xf32>
      %c6 = arith.constant 6 : index
      %c0_92 = arith.constant 0 : index
      %141 = vector.load %arg14[%c6, %c0_92] : memref<16x32xf32, #tpu.memory_space<vmem>>, vector<2x8xf32>
      tpu.vector_store %arg14[%c6, %c0_92], %140 {strides = array<i32>} : memref<16x32xf32, #tpu.memory_space<vmem>>, vector<2x8xf32>,
      %c1_93 = arith.constant 1 : index
      %c0_94 = arith.constant 0 : index
      %142 = tpu.strided_load %arg16[%c1_93, %c0_94] {strides = array<i32: 4, 1>} : memref<8x8xf32, #tpu.memory_space<vmem>>, vector<2x8xf32>
      %c6_95 = arith.constant 6 : index
      %c8_96 = arith.constant 8 : index
      %143 = vector.load %arg14[%c6_95, %c8_96] : memref<16x32xf32, #tpu.memory_space<vmem>>, vector<2x8xf32>
      tpu.vector_store %arg14[%c6_95, %c8_96], %142 {strides = array<i32>} : memref<16x32xf32, #tpu.memory_space<vmem>>, vector<2x8xf32>,
      %c2_97 = arith.constant 2 : index
      %c0_98 = arith.constant 0 : index
      %144 = tpu.strided_load %arg16[%c2_97, %c0_98] {strides = array<i32: 4, 1>} : memref<8x8xf32, #tpu.memory_space<vmem>>, vector<2x8xf32>
      %c6_99 = arith.constant 6 : index
      %c16_100 = arith.constant 16 : index
      %145 = vector.load %arg14[%c6_99, %c16_100] : memref<16x32xf32, #tpu.memory_space<vmem>>, vector<2x8xf32>
      tpu.vector_store %arg14[%c6_99, %c16_100], %144 {strides = array<i32>} : memref<16x32xf32, #tpu.memory_space<vmem>>, vector<2x8xf32>,
      %c3_101 = arith.constant 3 : index
      %c0_102 = arith.constant 0 : index
      %146 = tpu.strided_load %arg16[%c3_101, %c0_102] {strides = array<i32: 4, 1>} : memref<8x8xf32, #tpu.memory_space<vmem>>, vector<2x8xf32>
      %c6_103 = arith.constant 6 : index
      %c24_104 = arith.constant 24 : index
      %147 = vector.load %arg14[%c6_103, %c24_104] : memref<16x32xf32, #tpu.memory_space<vmem>>, vector<2x8xf32>
      tpu.vector_store %arg14[%c6_103, %c24_104], %146 {strides = array<i32>} : memref<16x32xf32, #tpu.memory_space<vmem>>, vector<2x8xf32>,
      %148 = vector.extract_strided_slice %26 {offsets = [8, 0], sizes = [8, 96], strides = [1, 1]} : vector<16x96xf32> to vector<8x96xf32>
      %149 = vector.extract_strided_slice %148 {offsets = [0, 0], sizes = [8, 8], strides = [1, 1]} : vector<8x96xf32> to vector<8x8xf32>
      %150 = arith.truncf %149 : vector<8x8xf32> to vector<8x8xbf16>
      %151 = vector.extract_strided_slice %148 {offsets = [0, 32], sizes = [8, 8], strides = [1, 1]} : vector<8x96xf32> to vector<8x8xf32>
      %152 = arith.truncf %151 : vector<8x8xf32> to vector<8x8xbf16>
      %153 = vector.extract_strided_slice %148 {offsets = [0, 64], sizes = [8, 8], strides = [1, 1]} : vector<8x96xf32> to vector<8x8xf32>
      %154 = arith.truncf %153 : vector<8x8xf32> to vector<8x8xbf16>
      %cst_105 = arith.constant dense<0.000000e+00> : vector<8x8xf32>
      %155 = tpu.matmul %150, %152, %cst_105 {dimension_numbers = #tpu.dot_dimension_numbers<[1], [1], [0], [0], [0, 0, 1, 0], [], []>} : vector<8x8xbf16>, vector<8x8xbf16>, vector<8x8xf32> -> vector<8x8xf32>
      %cst_106 = arith.constant 0.176776692 : f32
      %156 = vector.broadcast %cst_106 : f32 to vector<8x8xf32>
      %157 = arith.mulf %155, %156 : vector<8x8xf32>
      %cst_107 = arith.constant dense<0xFF800000> : vector<8xf32>
      %158 = vector.multi_reduction <maximumf>, %157, %cst_107 [1] : vector<8x8xf32> to vector<8xf32>
      %159 = vector.shape_cast %158 : vector<8xf32> to vector<8x1xf32>
      %160 = vector.broadcast %159 : vector<8x1xf32> to vector<8x8xf32>
      %161 = arith.subf %157, %160 : vector<8x8xf32>
      %162 = math.exp %161 : vector<8x8xf32>
      %cst_108 = arith.constant dense<0.000000e+00> : vector<8xf32>
      %163 = vector.multi_reduction <add>, %162, %cst_108 [1] : vector<8x8xf32> to vector<8xf32>
      %164 = vector.shape_cast %163 : vector<8xf32> to vector<8x1xf32>
      %165 = tpu.reciprocal %164 {approx = true} : vector<8x1xf32> -> vector<8x1xf32>
      %166 = vector.broadcast %165 : vector<8x1xf32> to vector<8x8xf32>
      %167 = arith.mulf %162, %166 : vector<8x8xf32>
      %168 = arith.truncf %167 : vector<8x8xf32> to vector<8x8xbf16>
      %cst_109 = arith.constant dense<0.000000e+00> : vector<8x8xf32>
      %169 = tpu.matmul %168, %154, %cst_109 {dimension_numbers = #tpu.dot_dimension_numbers<[1], [0], [0], [1], [0, 0, 1, 1], [], []>} : vector<8x8xbf16>, vector<8x8xbf16>, vector<8x8xf32> -> vector<8x8xf32>
      %c0_110 = arith.constant 0 : index
      %c0_111 = arith.constant 0 : index
      %170 = vector.load %arg16[%c0_110, %c0_111] : memref<8x8xf32, #tpu.memory_space<vmem>>, vector<8x8xf32>
      tpu.vector_store %arg16[%c0_110, %c0_111], %169 {strides = array<i32>} : memref<8x8xf32, #tpu.memory_space<vmem>>, vector<8x8xf32>,
      %c0_112 = arith.constant 0 : index
      %c0_113 = arith.constant 0 : index
      %171 = tpu.strided_load %arg16[%c0_112, %c0_113] {strides = array<i32: 4, 1>} : memref<8x8xf32, #tpu.memory_space<vmem>>, vector<2x8xf32>
      %c8_114 = arith.constant 8 : index
      %c0_115 = arith.constant 0 : index
      %172 = vector.load %arg14[%c8_114, %c0_115] : memref<16x32xf32, #tpu.memory_space<vmem>>, vector<2x8xf32>
      tpu.vector_store %arg14[%c8_114, %c0_115], %171 {strides = array<i32>} : memref<16x32xf32, #tpu.memory_space<vmem>>, vector<2x8xf32>,
      %c1_116 = arith.constant 1 : index
      %c0_117 = arith.constant 0 : index
      %173 = tpu.strided_load %arg16[%c1_116, %c0_117] {strides = array<i32: 4, 1>} : memref<8x8xf32, #tpu.memory_space<vmem>>, vector<2x8xf32>
      %c8_118 = arith.constant 8 : index
      %c8_119 = arith.constant 8 : index
      %174 = vector.load %arg14[%c8_118, %c8_119] : memref<16x32xf32, #tpu.memory_space<vmem>>, vector<2x8xf32>
      tpu.vector_store %arg14[%c8_118, %c8_119], %173 {strides = array<i32>} : memref<16x32xf32, #tpu.memory_space<vmem>>, vector<2x8xf32>,
      %c2_120 = arith.constant 2 : index
      %c0_121 = arith.constant 0 : index
      %175 = tpu.strided_load %arg16[%c2_120, %c0_121] {strides = array<i32: 4, 1>} : memref<8x8xf32, #tpu.memory_space<vmem>>, vector<2x8xf32>
      %c8_122 = arith.constant 8 : index
      %c16_123 = arith.constant 16 : index
      %176 = vector.load %arg14[%c8_122, %c16_123] : memref<16x32xf32, #tpu.memory_space<vmem>>, vector<2x8xf32>
      tpu.vector_store %arg14[%c8_122, %c16_123], %175 {strides = array<i32>} : memref<16x32xf32, #tpu.memory_space<vmem>>, vector<2x8xf32>,
      %c3_124 = arith.constant 3 : index
      %c0_125 = arith.constant 0 : index
      %177 = tpu.strided_load %arg16[%c3_124, %c0_125] {strides = array<i32: 4, 1>} : memref<8x8xf32, #tpu.memory_space<vmem>>, vector<2x8xf32>
      %c8_126 = arith.constant 8 : index
      %c24_127 = arith.constant 24 : index
      %178 = vector.load %arg14[%c8_126, %c24_127] : memref<16x32xf32, #tpu.memory_space<vmem>>, vector<2x8xf32>
      tpu.vector_store %arg14[%c8_126, %c24_127], %177 {strides = array<i32>} : memref<16x32xf32, #tpu.memory_space<vmem>>, vector<2x8xf32>,
      %179 = vector.extract_strided_slice %148 {offsets = [0, 8], sizes = [8, 8], strides = [1, 1]} : vector<8x96xf32> to vector<8x8xf32>
      %180 = arith.truncf %179 : vector<8x8xf32> to vector<8x8xbf16>
      %181 = vector.extract_strided_slice %148 {offsets = [0, 40], sizes = [8, 8], strides = [1, 1]} : vector<8x96xf32> to vector<8x8xf32>
      %182 = arith.truncf %181 : vector<8x8xf32> to vector<8x8xbf16>
      %183 = vector.extract_strided_slice %148 {offsets = [0, 72], sizes = [8, 8], strides = [1, 1]} : vector<8x96xf32> to vector<8x8xf32>
      %184 = arith.truncf %183 : vector<8x8xf32> to vector<8x8xbf16>
      %cst_128 = arith.constant dense<0.000000e+00> : vector<8x8xf32>
      %185 = tpu.matmul %180, %182, %cst_128 {dimension_numbers = #tpu.dot_dimension_numbers<[1], [1], [0], [0], [0, 0, 1, 0], [], []>} : vector<8x8xbf16>, vector<8x8xbf16>, vector<8x8xf32> -> vector<8x8xf32>
      %cst_129 = arith.constant 0.176776692 : f32
      %186 = vector.broadcast %cst_129 : f32 to vector<8x8xf32>
      %187 = arith.mulf %185, %186 : vector<8x8xf32>
      %cst_130 = arith.constant dense<0xFF800000> : vector<8xf32>
      %188 = vector.multi_reduction <maximumf>, %187, %cst_130 [1] : vector<8x8xf32> to vector<8xf32>
      %189 = vector.shape_cast %188 : vector<8xf32> to vector<8x1xf32>
      %190 = vector.broadcast %189 : vector<8x1xf32> to vector<8x8xf32>
      %191 = arith.subf %187, %190 : vector<8x8xf32>
      %192 = math.exp %191 : vector<8x8xf32>
      %cst_131 = arith.constant dense<0.000000e+00> : vector<8xf32>
      %193 = vector.multi_reduction <add>, %192, %cst_131 [1] : vector<8x8xf32> to vector<8xf32>
      %194 = vector.shape_cast %193 : vector<8xf32> to vector<8x1xf32>
      %195 = tpu.reciprocal %194 {approx = true} : vector<8x1xf32> -> vector<8x1xf32>
      %196 = vector.broadcast %195 : vector<8x1xf32> to vector<8x8xf32>
      %197 = arith.mulf %192, %196 : vector<8x8xf32>
      %198 = arith.truncf %197 : vector<8x8xf32> to vector<8x8xbf16>
      %cst_132 = arith.constant dense<0.000000e+00> : vector<8x8xf32>
      %199 = tpu.matmul %198, %184, %cst_132 {dimension_numbers = #tpu.dot_dimension_numbers<[1], [0], [0], [1], [0, 0, 1, 1], [], []>} : vector<8x8xbf16>, vector<8x8xbf16>, vector<8x8xf32> -> vector<8x8xf32>
      %c0_133 = arith.constant 0 : index
      %c0_134 = arith.constant 0 : index
      %200 = vector.load %arg16[%c0_133, %c0_134] : memref<8x8xf32, #tpu.memory_space<vmem>>, vector<8x8xf32>
      tpu.vector_store %arg16[%c0_133, %c0_134], %199 {strides = array<i32>} : memref<8x8xf32, #tpu.memory_space<vmem>>, vector<8x8xf32>,
      %c0_135 = arith.constant 0 : index
      %c0_136 = arith.constant 0 : index
      %201 = tpu.strided_load %arg16[%c0_135, %c0_136] {strides = array<i32: 4, 1>} : memref<8x8xf32, #tpu.memory_space<vmem>>, vector<2x8xf32>
      %c10 = arith.constant 10 : index
      %c0_137 = arith.constant 0 : index
      %202 = vector.load %arg14[%c10, %c0_137] : memref<16x32xf32, #tpu.memory_space<vmem>>, vector<2x8xf32>
      tpu.vector_store %arg14[%c10, %c0_137], %201 {strides = array<i32>} : memref<16x32xf32, #tpu.memory_space<vmem>>, vector<2x8xf32>,
      %c1_138 = arith.constant 1 : index
      %c0_139 = arith.constant 0 : index
      %203 = tpu.strided_load %arg16[%c1_138, %c0_139] {strides = array<i32: 4, 1>} : memref<8x8xf32, #tpu.memory_space<vmem>>, vector<2x8xf32>
      %c10_140 = arith.constant 10 : index
      %c8_141 = arith.constant 8 : index
      %204 = vector.load %arg14[%c10_140, %c8_141] : memref<16x32xf32, #tpu.memory_space<vmem>>, vector<2x8xf32>
      tpu.vector_store %arg14[%c10_140, %c8_141], %203 {strides = array<i32>} : memref<16x32xf32, #tpu.memory_space<vmem>>, vector<2x8xf32>,
      %c2_142 = arith.constant 2 : index
      %c0_143 = arith.constant 0 : index
      %205 = tpu.strided_load %arg16[%c2_142, %c0_143] {strides = array<i32: 4, 1>} : memref<8x8xf32, #tpu.memory_space<vmem>>, vector<2x8xf32>
      %c10_144 = arith.constant 10 : index
      %c16_145 = arith.constant 16 : index
      %206 = vector.load %arg14[%c10_144, %c16_145] : memref<16x32xf32, #tpu.memory_space<vmem>>, vector<2x8xf32>
      tpu.vector_store %arg14[%c10_144, %c16_145], %205 {strides = array<i32>} : memref<16x32xf32, #tpu.memory_space<vmem>>, vector<2x8xf32>,
      %c3_146 = arith.constant 3 : index
      %c0_147 = arith.constant 0 : index
      %207 = tpu.strided_load %arg16[%c3_146, %c0_147] {strides = array<i32: 4, 1>} : memref<8x8xf32, #tpu.memory_space<vmem>>, vector<2x8xf32>
      %c10_148 = arith.constant 10 : index
      %c24_149 = arith.constant 24 : index
      %208 = vector.load %arg14[%c10_148, %c24_149] : memref<16x32xf32, #tpu.memory_space<vmem>>, vector<2x8xf32>
      tpu.vector_store %arg14[%c10_148, %c24_149], %207 {strides = array<i32>} : memref<16x32xf32, #tpu.memory_space<vmem>>, vector<2x8xf32>,
      %209 = vector.extract_strided_slice %148 {offsets = [0, 16], sizes = [8, 8], strides = [1, 1]} : vector<8x96xf32> to vector<8x8xf32>
      %210 = arith.truncf %209 : vector<8x8xf32> to vector<8x8xbf16>
      %211 = vector.extract_strided_slice %148 {offsets = [0, 48], sizes = [8, 8], strides = [1, 1]} : vector<8x96xf32> to vector<8x8xf32>
      %212 = arith.truncf %211 : vector<8x8xf32> to vector<8x8xbf16>
      %213 = vector.extract_strided_slice %148 {offsets = [0, 80], sizes = [8, 8], strides = [1, 1]} : vector<8x96xf32> to vector<8x8xf32>
      %214 = arith.truncf %213 : vector<8x8xf32> to vector<8x8xbf16>
      %cst_150 = arith.constant dense<0.000000e+00> : vector<8x8xf32>
      %215 = tpu.matmul %210, %212, %cst_150 {dimension_numbers = #tpu.dot_dimension_numbers<[1], [1], [0], [0], [0, 0, 1, 0], [], []>} : vector<8x8xbf16>, vector<8x8xbf16>, vector<8x8xf32> -> vector<8x8xf32>
      %cst_151 = arith.constant 0.176776692 : f32
      %216 = vector.broadcast %cst_151 : f32 to vector<8x8xf32>
      %217 = arith.mulf %215, %216 : vector<8x8xf32>
      %cst_152 = arith.constant dense<0xFF800000> : vector<8xf32>
      %218 = vector.multi_reduction <maximumf>, %217, %cst_152 [1] : vector<8x8xf32> to vector<8xf32>
      %219 = vector.shape_cast %218 : vector<8xf32> to vector<8x1xf32>
      %220 = vector.broadcast %219 : vector<8x1xf32> to vector<8x8xf32>
      %221 = arith.subf %217, %220 : vector<8x8xf32>
      %222 = math.exp %221 : vector<8x8xf32>
      %cst_153 = arith.constant dense<0.000000e+00> : vector<8xf32>
      %223 = vector.multi_reduction <add>, %222, %cst_153 [1] : vector<8x8xf32> to vector<8xf32>
      %224 = vector.shape_cast %223 : vector<8xf32> to vector<8x1xf32>
      %225 = tpu.reciprocal %224 {approx = true} : vector<8x1xf32> -> vector<8x1xf32>
      %226 = vector.broadcast %225 : vector<8x1xf32> to vector<8x8xf32>
      %227 = arith.mulf %222, %226 : vector<8x8xf32>
      %228 = arith.truncf %227 : vector<8x8xf32> to vector<8x8xbf16>
      %cst_154 = arith.constant dense<0.000000e+00> : vector<8x8xf32>
      %229 = tpu.matmul %228, %214, %cst_154 {dimension_numbers = #tpu.dot_dimension_numbers<[1], [0], [0], [1], [0, 0, 1, 1], [], []>} : vector<8x8xbf16>, vector<8x8xbf16>, vector<8x8xf32> -> vector<8x8xf32>
      %c0_155 = arith.constant 0 : index
      %c0_156 = arith.constant 0 : index
      %230 = vector.load %arg16[%c0_155, %c0_156] : memref<8x8xf32, #tpu.memory_space<vmem>>, vector<8x8xf32>
      tpu.vector_store %arg16[%c0_155, %c0_156], %229 {strides = array<i32>} : memref<8x8xf32, #tpu.memory_space<vmem>>, vector<8x8xf32>,
      %c0_157 = arith.constant 0 : index
      %c0_158 = arith.constant 0 : index
      %231 = tpu.strided_load %arg16[%c0_157, %c0_158] {strides = array<i32: 4, 1>} : memref<8x8xf32, #tpu.memory_space<vmem>>, vector<2x8xf32>
      %c12 = arith.constant 12 : index
      %c0_159 = arith.constant 0 : index
      %232 = vector.load %arg14[%c12, %c0_159] : memref<16x32xf32, #tpu.memory_space<vmem>>, vector<2x8xf32>
      tpu.vector_store %arg14[%c12, %c0_159], %231 {strides = array<i32>} : memref<16x32xf32, #tpu.memory_space<vmem>>, vector<2x8xf32>,
      %c1_160 = arith.constant 1 : index
      %c0_161 = arith.constant 0 : index
      %233 = tpu.strided_load %arg16[%c1_160, %c0_161] {strides = array<i32: 4, 1>} : memref<8x8xf32, #tpu.memory_space<vmem>>, vector<2x8xf32>
      %c12_162 = arith.constant 12 : index
      %c8_163 = arith.constant 8 : index
      %234 = vector.load %arg14[%c12_162, %c8_163] : memref<16x32xf32, #tpu.memory_space<vmem>>, vector<2x8xf32>
      tpu.vector_store %arg14[%c12_162, %c8_163], %233 {strides = array<i32>} : memref<16x32xf32, #tpu.memory_space<vmem>>, vector<2x8xf32>,
      %c2_164 = arith.constant 2 : index
      %c0_165 = arith.constant 0 : index
      %235 = tpu.strided_load %arg16[%c2_164, %c0_165] {strides = array<i32: 4, 1>} : memref<8x8xf32, #tpu.memory_space<vmem>>, vector<2x8xf32>
      %c12_166 = arith.constant 12 : index
      %c16_167 = arith.constant 16 : index
      %236 = vector.load %arg14[%c12_166, %c16_167] : memref<16x32xf32, #tpu.memory_space<vmem>>, vector<2x8xf32>
      tpu.vector_store %arg14[%c12_166, %c16_167], %235 {strides = array<i32>} : memref<16x32xf32, #tpu.memory_space<vmem>>, vector<2x8xf32>,
      %c3_168 = arith.constant 3 : index
      %c0_169 = arith.constant 0 : index
      %237 = tpu.strided_load %arg16[%c3_168, %c0_169] {strides = array<i32: 4, 1>} : memref<8x8xf32, #tpu.memory_space<vmem>>, vector<2x8xf32>
      %c12_170 = arith.constant 12 : index
      %c24_171 = arith.constant 24 : index
      %238 = vector.load %arg14[%c12_170, %c24_171] : memref<16x32xf32, #tpu.memory_space<vmem>>, vector<2x8xf32>
      tpu.vector_store %arg14[%c12_170, %c24_171], %237 {strides = array<i32>} : memref<16x32xf32, #tpu.memory_space<vmem>>, vector<2x8xf32>,
      %239 = vector.extract_strided_slice %148 {offsets = [0, 24], sizes = [8, 8], strides = [1, 1]} : vector<8x96xf32> to vector<8x8xf32>
      %240 = arith.truncf %239 : vector<8x8xf32> to vector<8x8xbf16>
      %241 = vector.extract_strided_slice %148 {offsets = [0, 56], sizes = [8, 8], strides = [1, 1]} : vector<8x96xf32> to vector<8x8xf32>
      %242 = arith.truncf %241 : vector<8x8xf32> to vector<8x8xbf16>
      %243 = vector.extract_strided_slice %148 {offsets = [0, 88], sizes = [8, 8], strides = [1, 1]} : vector<8x96xf32> to vector<8x8xf32>
      %244 = arith.truncf %243 : vector<8x8xf32> to vector<8x8xbf16>
      %cst_172 = arith.constant dense<0.000000e+00> : vector<8x8xf32>
      %245 = tpu.matmul %240, %242, %cst_172 {dimension_numbers = #tpu.dot_dimension_numbers<[1], [1], [0], [0], [0, 0, 1, 0], [], []>} : vector<8x8xbf16>, vector<8x8xbf16>, vector<8x8xf32> -> vector<8x8xf32>
      %cst_173 = arith.constant 0.176776692 : f32
      %246 = vector.broadcast %cst_173 : f32 to vector<8x8xf32>
      %247 = arith.mulf %245, %246 : vector<8x8xf32>
      %cst_174 = arith.constant dense<0xFF800000> : vector<8xf32>
      %248 = vector.multi_reduction <maximumf>, %247, %cst_174 [1] : vector<8x8xf32> to vector<8xf32>
      %249 = vector.shape_cast %248 : vector<8xf32> to vector<8x1xf32>
      %250 = vector.broadcast %249 : vector<8x1xf32> to vector<8x8xf32>
      %251 = arith.subf %247, %250 : vector<8x8xf32>
      %252 = math.exp %251 : vector<8x8xf32>
      %cst_175 = arith.constant dense<0.000000e+00> : vector<8xf32>
      %253 = vector.multi_reduction <add>, %252, %cst_175 [1] : vector<8x8xf32> to vector<8xf32>
      %254 = vector.shape_cast %253 : vector<8xf32> to vector<8x1xf32>
      %255 = tpu.reciprocal %254 {approx = true} : vector<8x1xf32> -> vector<8x1xf32>
      %256 = vector.broadcast %255 : vector<8x1xf32> to vector<8x8xf32>
      %257 = arith.mulf %252, %256 : vector<8x8xf32>
      %258 = arith.truncf %257 : vector<8x8xf32> to vector<8x8xbf16>
      %cst_176 = arith.constant dense<0.000000e+00> : vector<8x8xf32>
      %259 = tpu.matmul %258, %244, %cst_176 {dimension_numbers = #tpu.dot_dimension_numbers<[1], [0], [0], [1], [0, 0, 1, 1], [], []>} : vector<8x8xbf16>, vector<8x8xbf16>, vector<8x8xf32> -> vector<8x8xf32>
      %c0_177 = arith.constant 0 : index
      %c0_178 = arith.constant 0 : index
      %260 = vector.load %arg16[%c0_177, %c0_178] : memref<8x8xf32, #tpu.memory_space<vmem>>, vector<8x8xf32>
      tpu.vector_store %arg16[%c0_177, %c0_178], %259 {strides = array<i32>} : memref<8x8xf32, #tpu.memory_space<vmem>>, vector<8x8xf32>,
      %c0_179 = arith.constant 0 : index
      %c0_180 = arith.constant 0 : index
      %261 = tpu.strided_load %arg16[%c0_179, %c0_180] {strides = array<i32: 4, 1>} : memref<8x8xf32, #tpu.memory_space<vmem>>, vector<2x8xf32>
      %c14 = arith.constant 14 : index
      %c0_181 = arith.constant 0 : index
      %262 = vector.load %arg14[%c14, %c0_181] : memref<16x32xf32, #tpu.memory_space<vmem>>, vector<2x8xf32>
      tpu.vector_store %arg14[%c14, %c0_181], %261 {strides = array<i32>} : memref<16x32xf32, #tpu.memory_space<vmem>>, vector<2x8xf32>,
      %c1_182 = arith.constant 1 : index
      %c0_183 = arith.constant 0 : index
      %263 = tpu.strided_load %arg16[%c1_182, %c0_183] {strides = array<i32: 4, 1>} : memref<8x8xf32, #tpu.memory_space<vmem>>, vector<2x8xf32>
      %c14_184 = arith.constant 14 : index
      %c8_185 = arith.constant 8 : index
      %264 = vector.load %arg14[%c14_184, %c8_185] : memref<16x32xf32, #tpu.memory_space<vmem>>, vector<2x8xf32>
      tpu.vector_store %arg14[%c14_184, %c8_185], %263 {strides = array<i32>} : memref<16x32xf32, #tpu.memory_space<vmem>>, vector<2x8xf32>,
      %c2_186 = arith.constant 2 : index
      %c0_187 = arith.constant 0 : index
      %265 = tpu.strided_load %arg16[%c2_186, %c0_187] {strides = array<i32: 4, 1>} : memref<8x8xf32, #tpu.memory_space<vmem>>, vector<2x8xf32>
      %c14_188 = arith.constant 14 : index
      %c16_189 = arith.constant 16 : index
      %266 = vector.load %arg14[%c14_188, %c16_189] : memref<16x32xf32, #tpu.memory_space<vmem>>, vector<2x8xf32>
      tpu.vector_store %arg14[%c14_188, %c16_189], %265 {strides = array<i32>} : memref<16x32xf32, #tpu.memory_space<vmem>>, vector<2x8xf32>,
      %c3_190 = arith.constant 3 : index
      %c0_191 = arith.constant 0 : index
      %267 = tpu.strided_load %arg16[%c3_190, %c0_191] {strides = array<i32: 4, 1>} : memref<8x8xf32, #tpu.memory_space<vmem>>, vector<2x8xf32>
      %c14_192 = arith.constant 14 : index
      %c24_193 = arith.constant 24 : index
      %268 = vector.load %arg14[%c14_192, %c24_193] : memref<16x32xf32, #tpu.memory_space<vmem>>, vector<2x8xf32>
      tpu.vector_store %arg14[%c14_192, %c24_193], %267 {strides = array<i32>} : memref<16x32xf32, #tpu.memory_space<vmem>>, vector<2x8xf32>,
      %c0_194 = arith.constant 0 : index
      %c0_195 = arith.constant 0 : index
      %269 = vector.load %arg14[%c0_194, %c0_195] : memref<16x32xf32, #tpu.memory_space<vmem>>, vector<16x32xf32>
      %270 = arith.truncf %269 : vector<16x32xf32> to vector<16x32xbf16>
      %c0_196 = arith.constant 0 : index
      %c0_197 = arith.constant 0 : index
      %271 = vector.load %arg5[%c0_196, %c0_197] : memref<32x32xbf16, #tpu.memory_space<vmem>>, vector<32x32xbf16>
      %cst_198 = arith.constant dense<0.000000e+00> : vector<16x32xf32>
      %272 = tpu.matmul %270, %271, %cst_198 {dimension_numbers = #tpu.dot_dimension_numbers<[1], [0], [0], [1], [0, 0, 1, 1], [], []>} : vector<16x32xbf16>, vector<32x32xbf16>, vector<16x32xf32> -> vector<16x32xf32>
      %c0_199 = arith.constant 0 : index
      %c0_200 = arith.constant 0 : index
      %273 = vector.load %arg6[%c0_199, %c0_200] : memref<1x32xf32, #tpu.memory_space<vmem>>, vector<1x32xf32>
      %274 = vector.broadcast %273 : vector<1x32xf32> to vector<16x32xf32>
      %275 = arith.addf %272, %274 : vector<16x32xf32>
      %276 = arith.extf %21 : vector<16x32xbf16> to vector<16x32xf32>
      %277 = arith.addf %275, %276 : vector<16x32xf32>
      %cst_201 = arith.constant dense<0.000000e+00> : vector<16xf32>
      %278 = vector.multi_reduction <add>, %277, %cst_201 [1] : vector<16x32xf32> to vector<16xf32>
      %279 = vector.shape_cast %278 : vector<16xf32> to vector<16x1xf32>
      %cst_202 = arith.constant 3.200000e+01 : f32
      %280 = vector.broadcast %cst_202 : f32 to vector<16x1xf32>
      %281 = arith.divf %279, %280 : vector<16x1xf32>
      %282 = vector.broadcast %281 : vector<16x1xf32> to vector<16x32xf32>
      %283 = arith.subf %277, %282 : vector<16x32xf32>
      %284 = arith.mulf %283, %283 : vector<16x32xf32>
      %cst_203 = arith.constant dense<0.000000e+00> : vector<16xf32>
      %285 = vector.multi_reduction <add>, %284, %cst_203 [1] : vector<16x32xf32> to vector<16xf32>
      %286 = vector.shape_cast %285 : vector<16xf32> to vector<16x1xf32>
      %cst_204 = arith.constant 3.200000e+01 : f32
      %287 = vector.broadcast %cst_204 : f32 to vector<16x1xf32>
      %288 = arith.divf %286, %287 : vector<16x1xf32>
      %289 = vector.broadcast %281 : vector<16x1xf32> to vector<16x32xf32>
      %290 = arith.subf %277, %289 : vector<16x32xf32>
      %cst_205 = arith.constant 9.99999974E-6 : f32
      %291 = vector.broadcast %cst_205 : f32 to vector<16x1xf32>
      %292 = arith.addf %288, %291 : vector<16x1xf32>
      %293 = math.rsqrt %292 : vector<16x1xf32>
      %294 = vector.broadcast %293 : vector<16x1xf32> to vector<16x32xf32>
      %295 = arith.mulf %290, %294 : vector<16x32xf32>
      %c0_206 = arith.constant 0 : index
      %c0_207 = arith.constant 0 : index
      %296 = vector.load %arg7[%c0_206, %c0_207] : memref<1x32xf32, #tpu.memory_space<vmem>>, vector<1x32xf32>
      %297 = vector.broadcast %296 : vector<1x32xf32> to vector<16x32xf32>
      %298 = arith.mulf %295, %297 : vector<16x32xf32>
      %c0_208 = arith.constant 0 : index
      %c0_209 = arith.constant 0 : index
      %299 = vector.load %arg8[%c0_208, %c0_209] : memref<1x32xf32, #tpu.memory_space<vmem>>, vector<1x32xf32>
      %300 = vector.broadcast %299 : vector<1x32xf32> to vector<16x32xf32>
      %301 = arith.addf %298, %300 : vector<16x32xf32>
      %c0_210 = arith.constant 0 : index
      %c0_211 = arith.constant 0 : index
      %302 = vector.load %arg15[%c0_210, %c0_211] : memref<16x32xf32, #tpu.memory_space<vmem>>, vector<16x32xf32>
      tpu.vector_store %arg15[%c0_210, %c0_211], %301 {strides = array<i32>} : memref<16x32xf32, #tpu.memory_space<vmem>>, vector<16x32xf32>,
    } else {
    }
    %c0 = arith.constant 0 : index
    %c0_1 = arith.constant 0 : index
    %3 = vector.load %arg15[%c0, %c0_1] : memref<16x32xf32, #tpu.memory_space<vmem>>, vector<16x32xf32>
    %4 = arith.truncf %3 : vector<16x32xf32> to vector<16x32xbf16>
    %c0_2 = arith.constant 0 : index
    %c0_3 = arith.constant 0 : index
    %5 = vector.load %arg9[%c0_2, %c0_3] : memref<32x64xbf16, #tpu.memory_space<vmem>>, vector<32x64xbf16>
    %cst = arith.constant dense<0.000000e+00> : vector<16x64xf32>
    %6 = tpu.matmul %4, %5, %cst {dimension_numbers = #tpu.dot_dimension_numbers<[1], [0], [0], [1], [0, 0, 1, 1], [], []>} : vector<16x32xbf16>, vector<32x64xbf16>, vector<16x64xf32> -> vector<16x64xf32>
    %c0_4 = arith.constant 0 : index
    %c0_5 = arith.constant 0 : index
    %7 = vector.load %arg10[%c0_4, %c0_5] : memref<1x64xf32, #tpu.memory_space<vmem>>, vector<1x64xf32>
    %8 = vector.broadcast %7 : vector<1x64xf32> to vector<16x64xf32>
    %9 = arith.addf %6, %8 : vector<16x64xf32>
    %cst_6 = arith.constant 0.000000e+00 : f32
    %10 = vector.broadcast %cst_6 : f32 to vector<16x64xf32>
    %11 = arith.maximumf %9, %10 : vector<16x64xf32>
    %12 = arith.truncf %11 : vector<16x64xf32> to vector<16x64xbf16>
    %c0_7 = arith.constant 0 : index
    %c0_8 = arith.constant 0 : index
    %13 = vector.load %arg11[%c0_7, %c0_8] : memref<64x32xbf16, #tpu.memory_space<vmem>>, vector<64x32xbf16>
    %cst_9 = arith.constant dense<0.000000e+00> : vector<16x32xf32>
    %14 = tpu.matmul %12, %13, %cst_9 {dimension_numbers = #tpu.dot_dimension_numbers<[1], [0], [0], [1], [0, 0, 1, 1], [], []>} : vector<16x64xbf16>, vector<64x32xbf16>, vector<16x32xf32> -> vector<16x32xf32>
    %c0_i32_10 = arith.constant 0 : i32
    %15 = arith.cmpi eq, %arg1, %c0_i32_10 : i32
    %16 = arith.extui %15 : i1 to i32
    %c0_i32_11 = arith.constant 0 : i32
    %17 = arith.cmpi ne, %16, %c0_i32_11 : i32
    scf.if %17 {
      %c0_14 = arith.constant 0 : index
      %c0_15 = arith.constant 0 : index
      %21 = vector.load %arg12[%c0_14, %c0_15] : memref<1x32xf32, #tpu.memory_space<vmem>>, vector<1x32xf32>
      %22 = vector.broadcast %21 : vector<1x32xf32> to vector<16x32xf32>
      %23 = arith.addf %14, %22 : vector<16x32xf32>
      %c0_16 = arith.constant 0 : index
      %c0_17 = arith.constant 0 : index
      %24 = vector.load %arg13[%c0_16, %c0_17] : memref<16x32xf32, #tpu.memory_space<vmem>>, vector<16x32xf32>
      tpu.vector_store %arg13[%c0_16, %c0_17], %23 {strides = array<i32>} : memref<16x32xf32, #tpu.memory_space<vmem>>, vector<16x32xf32>,
    } else {
    }
    %c0_i32_12 = arith.constant 0 : i32
    %18 = arith.cmpi ne, %arg1, %c0_i32_12 : i32
    %19 = arith.extui %18 : i1 to i32
    %c0_i32_13 = arith.constant 0 : i32
    %20 = arith.cmpi ne, %19, %c0_i32_13 : i32
    scf.if %20 {
      %c0_14 = arith.constant 0 : index
      %c0_15 = arith.constant 0 : index
      %21 = vector.load %arg13[%c0_14, %c0_15] : memref<16x32xf32, #tpu.memory_space<vmem>>, vector<16x32xf32>
      %22 = arith.addf %21, %14 : vector<16x32xf32>
      %c0_16 = arith.constant 0 : index
      %c0_17 = arith.constant 0 : index
      %23 = vector.load %arg13[%c0_16, %c0_17] : memref<16x32xf32, #tpu.memory_space<vmem>>, vector<16x32xf32>
      tpu.vector_store %arg13[%c0_16, %c0_17], %22 {strides = array<i32>} : memref<16x32xf32, #tpu.memory_space<vmem>>, vector<16x32xf32>,
    } else {
    }
    return
  }
  func.func @transform_0(%arg0: i32, %arg1: i32) -> (i32, i32) {
    %c0_i32 = arith.constant 0 : i32
    %c0_i32_0 = arith.constant 0 : i32
    return %arg0, %c0_i32 : i32, i32
  }
  func.func @transform_1(%arg0: i32, %arg1: i32) -> (i32, i32) {
    %c0_i32 = arith.constant 0 : i32
    %c0_i32_0 = arith.constant 0 : i32
    %c0_i32_1 = arith.constant 0 : i32
    return %c0_i32, %c0_i32_0 : i32, i32
  }
  func.func @transform_2(%arg0: i32, %arg1: i32) -> (i32, i32) {
    %c0_i32 = arith.constant 0 : i32
    %c0_i32_0 = arith.constant 0 : i32
    %c0_i32_1 = arith.constant 0 : i32
    return %c0_i32, %c0_i32_0 : i32, i32
  }
  func.func @transform_3(%arg0: i32, %arg1: i32) -> (i32, i32) {
    %c0_i32 = arith.constant 0 : i32
    %c0_i32_0 = arith.constant 0 : i32
    %c0_i32_1 = arith.constant 0 : i32
    return %c0_i32, %c0_i32_0 : i32, i32
  }
  func.func @transform_4(%arg0: i32, %arg1: i32) -> (i32, i32) {
    %c0_i32 = arith.constant 0 : i32
    %c0_i32_0 = arith.constant 0 : i32
    %c0_i32_1 = arith.constant 0 : i32
    return %c0_i32, %c0_i32_0 : i32, i32
  }
  func.func @transform_5(%arg0: i32, %arg1: i32) -> (i32, i32) {
    %c0_i32 = arith.constant 0 : i32
    %c0_i32_0 = arith.constant 0 : i32
    %c0_i32_1 = arith.constant 0 : i32
    return %c0_i32, %c0_i32_0 : i32, i32
  }
  func.func @transform_6(%arg0: i32, %arg1: i32) -> (i32, i32) {
    %c0_i32 = arith.constant 0 : i32
    %c0_i32_0 = arith.constant 0 : i32
    %c0_i32_1 = arith.constant 0 : i32
    return %c0_i32, %c0_i32_0 : i32, i32
  }
  func.func @transform_7(%arg0: i32, %arg1: i32) -> (i32, i32) {
    %c0_i32 = arith.constant 0 : i32
    %c0_i32_0 = arith.constant 0 : i32
    return %c0_i32, %arg1 : i32, i32
  }
  func.func @transform_8(%arg0: i32, %arg1: i32) -> (i32, i32) {
    %c0_i32 = arith.constant 0 : i32
    %c0_i32_0 = arith.constant 0 : i32
    return %c0_i32, %arg1 : i32, i32
  }
  func.func @transform_9(%arg0: i32, %arg1: i32) -> (i32, i32) {
    %c0_i32 = arith.constant 0 : i32
    %c0_i32_0 = arith.constant 0 : i32
    return %arg1, %c0_i32 : i32, i32
  }
  func.func @transform_10(%arg0: i32, %arg1: i32) -> (i32, i32) {
    %c0_i32 = arith.constant 0 : i32
    %c0_i32_0 = arith.constant 0 : i32
    %c0_i32_1 = arith.constant 0 : i32
    return %c0_i32, %c0_i32_0 : i32, i32
  }
  func.func @transform_11(%arg0: i32, %arg1: i32) -> (i32, i32) {
    %c0_i32 = arith.constant 0 : i32
    %c0_i32_0 = arith.constant 0 : i32
    return %arg0, %c0_i32 : i32, i32
  }
}

</mosaic_0001>

<bundles_post_ra>
// kernel: tpu_custom_call.1
= control target key start
LH: loop header
LB: loop body
LE: loop exit
PB: predicated region body
PF: predicated region fallthrough
CT: control target
= control target key end

     0   :  { %16 = vsyncpa [#allocation6], 0  ;;  %s2271_s0 = inlined_call_operand.hbm [shape: bf16[16,32], index: 0, kind: input, shape index: {}]   ;;  %s2272_s1 = inlined_call_operand.vmem [shape: bf16[32,96], index: 1, kind: input, shape index: {}]   ;;  %s2273_s2 = inlined_call_operand.vmem [shape: f32[1,96], index: 2, kind: input, shape index: {}]   ;;  %s2274_s3 = inlined_call_operand.vmem [shape: bf16[32,32], index: 3, kind: input, shape index: {}]   ;;  %s2275_s4 = inlined_call_operand.vmem [shape: f32[1,32], index: 4, kind: input, shape index: {}]   ;;  %s2276_s5 = inlined_call_operand.vmem [shape: f32[1,32], index: 5, kind: input, shape index: {}]   ;;  %s2277_s6 = inlined_call_operand.vmem [shape: f32[1,32], index: 6, kind: input, shape index: {}]   ;;  %s2278_s7 = inlined_call_operand.vmem [shape: bf16[32,64], index: 7, kind: input, shape index: {}]   ;;  %s2279_s8 = inlined_call_operand.vmem [shape: f32[1,64], index: 8, kind: input, shape index: {}]   ;;  %s2280_s9 = inlined_call_operand.vmem [shape: bf16[64,32], index: 9, kind: input, shape index: {}]   ;;  %s2281_s10 = inlined_call_operand.vmem [shape: f32[1,32], index: 10, kind: input, shape index: {}]   ;;  %s2282_s11 = inlined_call_operand.hbm [shape: f32[16,32], index: 11, kind: output, shape index: {}]  }
   0x1   :  { %17 = vsyncpa [#allocation7], 0  ;;  %s1842_s17 = smov [#allocation5]   ;;  %s1794_s21 = scalar_lea.hbm %s2271_s0, 128 }
   0x2   :  { %s23_s18 = sshll.u32 %s1842_s17, 4  ;;  %p1795_p0 = scmp.ne.s32.totalorder %s2271_s0, %s1794_s21  ;;  %s24_s18 = int_to_ptr.vmem [resolvable:$true] %s23_s18 }
   0x3   :  { %p1798_p1 = scmp.lt.u32.totalorder %s1794_s21, %s2271_s0 }
   0x5   :  { %p1800_p2 = pnand %p1798_p1, %p1795_p0 }
   0x7   :  { %1803 = shalt.err (!%p1800_p2)
}
   0x8   :  { %s1804_s26 = scalar_lea.vmem %s24_s18, 128  ;;  %p1809_p4 = scmp.lt.s32.totalorder %s24_s18, %s24_s18 }
   0x9   :  { %p1805_p3 = scmp.ne.s32.totalorder %s24_s18, %s1804_s26  ;;  %p1810_p5 = scmp.lt.s32.totalorder %s1804_s26, %s1804_s26 }
   0xb   :  { %p1811_p6 = por %p1810_p5, %p1809_p4 }
   0xd   :  { %p1812_p7 = pnand %p1811_p6, %p1805_p3 }
   0xf   :  { %1815 = shalt.err (!%p1812_p7)
}
  0x10   :  { %s1843_s27 = smov 64   ;;  %s1844_s28 = smov 4  }
  0x11   :  { %29 = dma.hbm_to_vmem [thread:$0]  %s2271_s0, 128, %s24_s18, [#allocation6], %s1843_s27, %s1843_s27, %s1844_s28  }
  0x12   :  { %1838 = dma.done.wait [#allocation6], 128  }
  0x13   :  { %1839 = vsyncadd [#allocation6], 4294967168  ;;  %v1845_v0 = vmov 0.0   ;;  %vm1846_vm0 = vmmov 0   ;;  %v1746_v1 = vld [vmem:[%s2272_s1] sm:$0xff]   ;;  %v1747_v2 = vld [vmem:[%s2272_s1 + $0x8] sm:$0xff]  }
  0x14   :  { %1594 = vmatprep.subr.bf16.mxu0 %v1845_v0  ;;  %1598 = vmatprep.mubr.msk.bf16.mxu0 %vm1846_vm0, %v1845_v0  ;;  %v1948_v3 = vld [vmem:[#allocation5] sm:$0xff]   ;;  %vm88_vm1 = vcmask 261120   ;;  %v1511_v4 = vld [vmem:[%s2273_s2] ss:$0 sm:$0xff]  ;;  %s1847_s1 = smov 120   ;;  %s1848_s17 = smov 96  }
  0x15   :  { %1602 = vmatprep.subr.bf16.mxu1 %v1845_v0  ;;  %1604 = vmatprep.mubr.msk.bf16.mxu1 %vm1846_vm0, %v1845_v0  ;;  %s1849_s18 = smov 80   ;;  %s1850_s19 = smov 88   ;;  %vm137_vm2 = vcmask 64512   ;;  %vm202_vm3 = vcmask 1043456   ;;  %vm248_vm4 = vcmask 58368   ;;  %vm256_vm5 = vcmask 123968  }
  0x16   :  { %1595 = vmatpush3.bf16.msra.mxu0 %v1746_v1  ;;  %s1851_s2 = smov 72   ;;  %s1852_s20 = smov 112   ;;  %vm264_vm6 = vcmask 189568   ;;  %vm272_vm7 = vcmask 255168   ;;  %vm1425_vm8 = vcmask 523264  }
  0x17   :  { %1596 = vmatprep.subr.bf16.mxu0 %v1845_v0  ;;  %s1853_s21 = smov 104   ;;  %s1854_s22 = smov 56  }
  0x18   :  { %s1855_s23 = smov 48   ;;  %s1856_s24 = smov 40  }
  0x19   :  { %s1857_s25 = smov 8   ;;  %s1858_s26 = smov 16  }
  0x1a   :  { %1597 = vmatpush3.bf16.msra.mxu0 %v1747_v2 }
  0x1b   :  { %1608 = vmatprep.subr.bf16.mxu0 %v1845_v0 }
  0x1d   :  { %1599 = vmatmul.mubr.msk.bf16.vlgmr.msra.gmra.mrb[0].mxu0 %vm88_vm1, %v1948_v3 }
  0x1e   :  { %1610 = vmatprep.mubr.msk.bf16.mxu0 %vm1846_vm0, %v1845_v0 }
  0xf0   :  { %v126_v5 = vpop.f32.mrb[0].mxu0 }
  0xf1   :  { %v127_v6 = vadd.f32 %v1511_v4, %v126_v5  ;;  %v1600_v7 = vpop.f32.mrb[1].mxu0 }
  0xf2   :  { %v129_v8 = vpop.f32.mrb[2].mxu0 }
  0xf3   :  { %v1959_v9 = vpack.c.bf16 %v127_v6, %v127_v6  ;;  %v1601_v10 = vpop.f32.mrb[3].mxu0  ;;  %v130_v11 = vadd.f32 %v1511_v4, %v129_v8 }
  0xf5   :  { %274 = vrot.lane.b32.xlu1 %v1959_v9, %s1847_s1  ;;  %135 = vrot.lane.b32.xlu0 %v1959_v9, %s1848_s17  ;;  %v1967_v12 = vpack.c.bf16 %v130_v11, %v130_v11 }
  0xf9   :  { %408 = vrot.lane.b32.xlu1 %v1959_v9, %s1849_s18  ;;  %276 = vrot.lane.b32.xlu0 %v1959_v9, %s1850_s19 }
  0xfd   :  { %540 = vrot.lane.b32.xlu1 %v1959_v9, %s1851_s2  ;;  %406 = vrot.lane.b32.xlu0 %v1959_v9, %s1852_s20 }
 0x101   :  { %538 = vrot.lane.b32.xlu0 %v1959_v9, %s1853_s21  ;;  %672 = vrot.lane.b32.xlu1 %v1967_v12, %s1848_s17 }
 0x105   :  { %804 = vrot.lane.b32.xlu0 %v1967_v12, %s1850_s19  ;;  %802 = vrot.lane.b32.xlu1 %v1967_v12, %s1847_s1 }
 0x109   :  { %936 = vrot.lane.b32.xlu0 %v1967_v12, %s1849_s18  ;;  %934 = vrot.lane.b32.xlu1 %v1967_v12, %s1852_s20 }
 0x10d   :  { %1068 = vrot.lane.b32.xlu0 %v1967_v12, %s1851_s2  ;;  %1066 = vrot.lane.b32.xlu1 %v1967_v12, %s1853_s21 }
 0x167   :  { %v136_v13 = vpop.permute.xlu0 %135  ;;  %v275_v16 = vpop.permute.xlu1 %274 }
 0x168   :  { %v142_v14 = vsel %vm137_vm2, %v136_v13, 0 }
 0x169   :  { %1603 = vmatpush3.bf16.xpose.msra.mxu1 %v142_v14 }
 0x16a   :  { %1614 = vmatprep.subr.bf16.mxu1 %v1845_v0 }
 0x16b   :  { %v277_v15 = vpop.permute.xlu0 %276  ;;  %v409_v18 = vpop.permute.xlu1 %408 }
 0x16c   :  { %v282_v17 = vsel %vm137_vm2, %v277_v15, 0  ;;  %v414_v19 = vsel %vm137_vm2, %v409_v18, 0 }
 0x16f   :  { %v541_v20 = vpop.permute.xlu1 %540  ;;  %v407_v21 = vpop.permute.xlu0 %406 }
 0x170   :  { %1605 = vmatmul.mubr.msk.bf16.vlgmr.msra.gmra.mrb[0].mxu1 %vm137_vm2, %v1959_v9  ;;  %v546_v22 = vsel %vm137_vm2, %v541_v20, 0 }
 0x171   :  { %1615 = vmatpush3.bf16.xpose.msra.mxu1 %v282_v17  ;;  %1616 = vmatprep.mubr.msk.bf16.mxu1 %vm1846_vm0, %v1845_v0 }
 0x172   :  { %1626 = vmatprep.subr.bf16.mxu1 %v1845_v0 }
 0x173   :  { %v673_v23 = vpop.permute.xlu1 %672  ;;  %v539_v24 = vpop.permute.xlu0 %538 }
 0x174   :  { %v678_v25 = vsel %vm137_vm2, %v673_v23, 0 }
 0x177   :  { %v805_v26 = vpop.permute.xlu0 %804  ;;  %v803_v29 = vpop.permute.xlu1 %802 }
 0x178   :  { %1617 = vmatmul.mubr.msk.bf16.vlgmr.msra.gmra.mrb[4].mxu1 %vm137_vm2, %v275_v16  ;;  %v810_v27 = vsel %vm137_vm2, %v805_v26, 0 }
 0x179   :  { %1627 = vmatpush3.bf16.xpose.msra.mxu1 %v414_v19  ;;  %1628 = vmatprep.mubr.msk.bf16.mxu1 %vm1846_vm0, %v1845_v0 }
 0x17a   :  { %1638 = vmatprep.subr.bf16.mxu1 %v1845_v0 }
 0x17b   :  { %v937_v28 = vpop.permute.xlu0 %936  ;;  %v935_v32 = vpop.permute.xlu1 %934 }
 0x17c   :  { %v942_v30 = vsel %vm137_vm2, %v937_v28, 0 }
 0x17f   :  { %v1069_v31 = vpop.permute.xlu0 %1068  ;;  %v1067_v34 = vpop.permute.xlu1 %1066 }
 0x180   :  { %1629 = vmatmul.mubr.msk.bf16.vlgmr.msra.gmra.mrb[8].mxu1 %vm137_vm2, %v407_v21  ;;  %v1074_v33 = vsel %vm137_vm2, %v1069_v31, 0 }
 0x181   :  { %1639 = vmatpush3.bf16.xpose.msra.mxu1 %v546_v22  ;;  %1640 = vmatprep.mubr.msk.bf16.mxu1 %vm1846_vm0, %v1845_v0 }
 0x182   :  { %1650 = vmatprep.subr.bf16.mxu1 %v1845_v0 }
 0x188   :  { %1641 = vmatmul.mubr.msk.bf16.vlgmr.msra.gmra.mrb[12].mxu1 %vm137_vm2, %v539_v24 }
 0x189   :  { %1651 = vmatpush3.bf16.xpose.msra.mxu1 %v678_v25  ;;  %1652 = vmatprep.mubr.msk.bf16.mxu1 %vm1846_vm0, %v1845_v0 }
 0x18a   :  { %1662 = vmatprep.subr.bf16.mxu1 %v1845_v0 }
 0x190   :  { %1653 = vmatmul.mubr.msk.bf16.vlgmr.msra.gmra.mrb[16].mxu1 %vm137_vm2, %v1967_v12 }
 0x191   :  { %1663 = vmatpush3.bf16.xpose.msra.mxu1 %v810_v27  ;;  %1664 = vmatprep.mubr.msk.bf16.mxu1 %vm1846_vm0, %v1845_v0 }
 0x192   :  { %1674 = vmatprep.subr.bf16.mxu1 %v1845_v0 }
 0x198   :  { %1665 = vmatmul.mubr.msk.bf16.vlgmr.msra.gmra.mrb[20].mxu1 %vm137_vm2, %v803_v29 }
 0x199   :  { %1675 = vmatpush3.bf16.xpose.msra.mxu1 %v942_v30  ;;  %1676 = vmatprep.mubr.msk.bf16.mxu1 %vm1846_vm0, %v1845_v0 }
 0x19a   :  { %1686 = vmatprep.subr.bf16.mxu1 %v1845_v0 }
 0x1a0   :  { %1677 = vmatmul.mubr.msk.bf16.vlgmr.msra.gmra.mrb[24].mxu1 %vm137_vm2, %v935_v32 }
 0x1a1   :  { %1687 = vmatpush3.bf16.xpose.msra.mxu1 %v1074_v33  ;;  %1688 = vmatprep.mubr.msk.bf16.mxu1 %vm1846_vm0, %v1845_v0 }
 0x1a2   :  { %1698 = vmatprep.subr.bf16.mxu1 %v1845_v0 }
 0x1a8   :  { %1689 = vmatmul.mubr.msk.bf16.vlgmr.msra.gmra.mrb[28].mxu1 %vm137_vm2, %v1067_v34 }
 0x1a9   :  { %1702 = vmatprep.mubr.msk.bf16.mxu1 %vm1846_vm0, %v1845_v0 }
 0x243   :  { %v178_v35 = vpop.f32.mrb[0].mxu1 }
 0x244   :  { %v184_v36 = vmul.f32 0.17677669, %v178_v35  ;;  %v1606_v37 = vpop.f32.mrb[1].mxu1 }
 0x245   :  { %v181_v38 = vpop.f32.mrb[2].mxu1 }
 0x246   :  { %v1607_v39 = vpop.f32.mrb[3].mxu1  ;;  %v185_v40 = vsel %vm137_vm2, %v184_v36, -inf }
 0x247   :  { %186 = vmax.xlane.f32.xlu0 %v185_v40 }
 0x24b   :  { %v318_v41 = vpop.f32.mrb[4].mxu1 }
 0x24c   :  { %v324_v42 = vmul.f32 0.17677669, %v318_v41  ;;  %v1618_v43 = vpop.f32.mrb[5].mxu1 }
 0x24d   :  { %v321_v44 = vpop.f32.mrb[6].mxu1 }
 0x24e   :  { %v1619_v45 = vpop.f32.mrb[7].mxu1  ;;  %v325_v46 = vsel %vm137_vm2, %v324_v42, -inf }
 0x24f   :  { %326 = vmax.xlane.f32.xlu1 %v325_v46 }
 0x253   :  { %v450_v47 = vpop.f32.mrb[8].mxu1 }
 0x254   :  { %v456_v48 = vmul.f32 0.17677669, %v450_v47  ;;  %v1630_v49 = vpop.f32.mrb[9].mxu1 }
 0x255   :  { %v453_v50 = vpop.f32.mrb[10].mxu1 }
 0x256   :  { %v1631_v51 = vpop.f32.mrb[11].mxu1  ;;  %v457_v52 = vsel %vm137_vm2, %v456_v48, -inf }
 0x257   :  { %458 = vmax.xlane.f32.xlu0 %v457_v52 }
 0x25b   :  { %v582_v53 = vpop.f32.mrb[12].mxu1 }
 0x25c   :  { %v2022_v54 = vmul.f32 0.17677669, %v582_v53  ;;  %v1642_v55 = vpop.f32.mrb[13].mxu1 }
 0x25d   :  { %v585_v56 = vpop.f32.mrb[14].mxu1 }
 0x25e   :  { %v1643_v57 = vpop.f32.mrb[15].mxu1  ;;  %v589_v58 = vsel %vm137_vm2, %v2022_v54, -inf }
 0x25f   :  { %590 = vmax.xlane.f32.xlu0 %v589_v58 }
 0x263   :  { %v714_v59 = vpop.f32.mrb[16].mxu1 }
 0x264   :  { %v2026_v60 = vmul.f32 0.17677669, %v714_v59  ;;  %v1654_v61 = vpop.f32.mrb[17].mxu1 }
 0x265   :  { %v717_v62 = vpop.f32.mrb[18].mxu1 }
 0x266   :  { %v1655_v63 = vpop.f32.mrb[19].mxu1  ;;  %v721_v1 = vsel %vm137_vm2, %v2026_v60, -inf }
 0x267   :  { %722 = vmax.xlane.f32.xlu1 %v721_v1 }
 0x26b   :  { %v846_v2 = vpop.f32.mrb[20].mxu1 }
 0x26c   :  { %v2030_v4 = vmul.f32 0.17677669, %v846_v2  ;;  %v1666_v5 = vpop.f32.mrb[21].mxu1 }
 0x26d   :  { %v849_v6 = vpop.f32.mrb[22].mxu1 }
 0x26e   :  { %v1667_v7 = vpop.f32.mrb[23].mxu1  ;;  %v853_v8 = vsel %vm137_vm2, %v2030_v4, -inf }
 0x26f   :  { %854 = vmax.xlane.f32.xlu0 %v853_v8 }
 0x273   :  { %v978_v10 = vpop.f32.mrb[24].mxu1 }
 0x274   :  { %v984_v11 = vmul.f32 0.17677669, %v978_v10  ;;  %v1678_v13 = vpop.f32.mrb[25].mxu1 }
 0x275   :  { %v981_v14 = vpop.f32.mrb[26].mxu1 }
 0x276   :  { %v1679_v15 = vpop.f32.mrb[27].mxu1  ;;  %v985_v16 = vsel %vm137_vm2, %v984_v11, -inf }
 0x277   :  { %986 = vmax.xlane.f32.xlu1 %v985_v16 }
 0x27b   :  { %v1110_v17 = vpop.f32.mrb[28].mxu1 }
 0x27c   :  { %v1690_v18 = vpop.f32.mrb[29].mxu1  ;;  %v2039_v21 = vmul.f32 0.17677669, %v1110_v17 }
 0x27d   :  { %v1113_v19 = vpop.f32.mrb[30].mxu1 }
 0x27e   :  { %v1691_v20 = vpop.f32.mrb[31].mxu1  ;;  %v1117_v22 = vsel %vm137_vm2, %v2039_v21, -inf }
 0x285   :  { %337 = vrot.lane.b32.xlu0 %v1959_v9, %s1854_s22 }
 0x288   :  { %197 = vrot.lane.b32.xlu1 %v1959_v9, %s1843_s27 }
 0x2a4   :  { %1118 = vmax.xlane.f32.xlu0 %v1117_v22 }
 0x2d4   :  { %v187_v23 = vpop.xlane.xlu0 %186 }
 0x2d5   :  { %v188_v24 = vsub.f32 %v184_v36, %v187_v23 }
 0x2d7   :  { %v189_v25 = vmul.f32 1.442695, %v188_v24 }
 0x2d9   :  { %1758 = vpow2.f32 %v189_v25 }
 0x2dc   :  { %v327_v26 = vpop.xlane.xlu1 %326 }
 0x2dd   :  { %v328_v27 = vsub.f32 %v324_v42, %v327_v26 }
 0x2df   :  { %v329_v28 = vmul.f32 1.442695, %v328_v27 }
 0x2e1   :  { %1760 = vpow2.f32 %v329_v28 }
 0x2e3   :  { %v2043_v29 = vpop.eup %1758 }
 0x2e4   :  { %v459_v30 = vpop.xlane.xlu0 %458  ;;  %v191_v31 = vsel %vm137_vm2, %v2043_v29, 0.0 }
 0x2e5   :  { %v460_v32 = vsub.f32 %v456_v48, %v459_v30  ;;  %192 = vadd.xlane.f32.xlu1 %v191_v31 }
 0x2e7   :  { %v461_v33 = vmul.f32 1.442695, %v460_v32 }
 0x2e9   :  { %1762 = vpow2.f32 %v461_v33 }
 0x2eb   :  { %v2047_v34 = vpop.eup %1760 }
 0x2ec   :  { %v331_v35 = vsel %vm137_vm2, %v2047_v34, 0.0  ;;  %v591_v41 = vpop.xlane.xlu0 %590 }
 0x2ed   :  { %332 = vadd.xlane.f32.xlu0 %v331_v35  ;;  %v592_v43 = vsub.f32 %v2022_v54, %v591_v41 }
 0x2ef   :  { %v593_v44 = vmul.f32 1.442695, %v592_v43 }
 0x2f1   :  { %1764 = vpow2.f32 %v593_v44 }
 0x2f3   :  { %v2051_v36 = vpop.eup %1762 }
 0x2f4   :  { %v463_v37 = vsel %vm137_vm2, %v2051_v36, 0.0  ;;  %v723_v38 = vpop.xlane.xlu1 %722 }
 0x2f5   :  { %464 = vadd.xlane.f32.xlu1 %v463_v37  ;;  %v724_v45 = vsub.f32 %v2026_v60, %v723_v38 }
 0x2f7   :  { %v725_v48 = vmul.f32 1.442695, %v724_v45 }
 0x2f9   :  { %1766 = vpow2.f32 %v725_v48 }
 0x2fb   :  { %v1765_v51 = vpop.eup %1764 }
 0x2fc   :  { %v855_v46 = vpop.xlane.xlu0 %854  ;;  %v595_v52 = vsel %vm137_vm2, %v1765_v51, 0.0 }
 0x2fd   :  { %v856_v47 = vsub.f32 %v2030_v4, %v855_v46 }
 0x300   :  { %v338_v59 = vpop.permute.xlu0 %337 }
 0x301   :  { %v343_v8 = vsel %vm202_vm3, %v338_v59, 0 }
 0x303   :  { %469 = vrot.lane.b32.xlu0 %v1959_v9, %s1855_s23  ;;  %v2065_v53 = vpop.eup %1766 }
 0x304   :  { %v987_v39 = vpop.xlane.xlu1 %986  ;;  %v727_v55 = vsel %vm137_vm2, %v2065_v53, 0.0 }
 0x305   :  { %v988_v49 = vsub.f32 %v984_v11, %v987_v39 }
 0x306   :  { %601 = vrot.lane.b32.xlu1 %v1959_v9, %s1856_s24  ;;  %v857_v9 = vmul.f32 1.442695, %v856_v47 }
 0x307   :  { %v989_v50 = vmul.f32 1.442695, %v988_v49 }
 0x308   :  { %v198_v40 = vpop.permute.xlu1 %197  ;;  %1768 = vpow2.f32 %v857_v9 }
 0x309   :  { %v204_v42 = vsel %vm202_vm3, %v198_v40, 0  ;;  %1770 = vpow2.f32 %v989_v50 }
 0x30a   :  { %1609 = vmatpush3.bf16.msra.mxu0 %v204_v42 }
 0x30b   :  { %1620 = vmatprep.subr.bf16.mxu0 %v1845_v0 }
 0x312   :  { %v2067_v54 = vpop.eup %1768 }
 0x313   :  { %v2071_v56 = vpop.eup %1770  ;;  %v859_v57 = vsel %vm137_vm2, %v2067_v54, 0.0 }
 0x314   :  { %v991_v58 = vsel %vm137_vm2, %v2071_v56, 0.0 }
 0x322   :  { %596 = vadd.xlane.f32.xlu0 %v595_v52 }
 0x326   :  { %728 = vadd.xlane.f32.xlu0 %v727_v55 }
 0x32a   :  { %860 = vadd.xlane.f32.xlu1 %v859_v57  ;;  %992 = vadd.xlane.f32.xlu0 %v991_v58 }
 0x331   :  { %v1119_v60 = vpop.xlane.xlu0 %1118 }
 0x332   :  { %v1120_v61 = vsub.f32 %v2039_v21, %v1119_v60 }
 0x334   :  { %v1121_v62 = vmul.f32 1.442695, %v1120_v61 }
 0x336   :  { %1772 = vpow2.f32 %v1121_v62 }
 0x33b   :  { %865 = vrot.lane.b32.xlu1 %v1967_v12, %s1854_s22 }
 0x33f   :  { %997 = vrot.lane.b32.xlu1 %v1967_v12, %s1855_s23 }
 0x340   :  { %v2082_v63 = vpop.eup %1772 }
 0x341   :  { %v1123_v1 = vsel %vm137_vm2, %v2082_v63, 0.0 }
 0x342   :  { %1124 = vadd.xlane.f32.xlu0 %v1123_v1 }
 0x343   :  { %1129 = vrot.lane.b32.xlu1 %v1967_v12, %s1856_s24 }
 0x358   :  { %733 = vrot.lane.b32.xlu0 %v1967_v12, %s1843_s27  ;;  %s1859_s27 = smov 24  }
 0x372   :  { %v193_v2 = vpop.xlane.xlu1 %192 }
 0x373   :  { %1774 = vrcp.f32 %v193_v2 }
 0x37a   :  { %v333_v4 = vpop.xlane.xlu0 %332 }
 0x37b   :  { %1776 = vrcp.f32 %v333_v4 }
 0x37d   :  { %v1775_v5 = vpop.eup %1774 }
 0x37e   :  { %v195_v6 = vmul.f32 %v1775_v5, %v2043_v29  ;;  %v470_v13 = vpop.permute.xlu0 %469 }
 0x37f   :  { %v475_v15 = vsel %vm202_vm3, %v470_v13, 0 }
 0x380   :  { %v196_v7 = vpack.c.bf16 %v195_v6, %v195_v6 }
 0x382   :  { %1611 = vmatmul.mubr.msk.bf16.vlgmr.msra.gmra.mrb[4].mxu0 %vm137_vm2, %v196_v7  ;;  %v465_v10 = vpop.xlane.xlu1 %464 }
 0x383   :  { %1621 = vmatpush3.bf16.msra.mxu0 %v343_v8  ;;  %1778 = vrcp.f32 %v465_v10  ;;  %1622 = vmatprep.mubr.msk.bf16.mxu0 %vm1846_vm0, %v1845_v0 }
 0x384   :  { %1632 = vmatprep.subr.bf16.mxu0 %v1845_v0 }
 0x385   :  { %v1777_v12 = vpop.eup %1776 }
 0x386   :  { %v335_v11 = vmul.f32 %v1777_v12, %v2047_v34  ;;  %v602_v18 = vpop.permute.xlu1 %601 }
 0x387   :  { %v607_v20 = vsel %vm202_vm3, %v602_v18, 0 }
 0x388   :  { %v336_v14 = vpack.c.bf16 %v335_v11, %v335_v11 }
 0x38a   :  { %1623 = vmatmul.mubr.msk.bf16.vlgmr.msra.gmra.mrb[8].mxu0 %vm137_vm2, %v336_v14 }
 0x38b   :  { %1633 = vmatpush3.bf16.msra.mxu0 %v475_v15  ;;  %1634 = vmatprep.mubr.msk.bf16.mxu0 %vm1846_vm0, %v1845_v0 }
 0x38c   :  { %1644 = vmatprep.subr.bf16.mxu0 %v1845_v0 }
 0x38d   :  { %v1779_v16 = vpop.eup %1778 }
 0x38e   :  { %v467_v17 = vmul.f32 %v1779_v16, %v2051_v36 }
 0x390   :  { %v468_v19 = vpack.c.bf16 %v467_v17, %v467_v17 }
 0x392   :  { %1635 = vmatmul.mubr.msk.bf16.vlgmr.msra.gmra.mrb[12].mxu0 %vm137_vm2, %v468_v19 }
 0x393   :  { %1645 = vmatpush3.bf16.msra.mxu0 %v607_v20  ;;  %1646 = vmatprep.mubr.msk.bf16.mxu0 %vm1846_vm0, %v1845_v0 }
 0x394   :  { %1656 = vmatprep.subr.bf16.mxu0 %v1845_v0 }
 0x3af   :  { %v597_v21 = vpop.xlane.xlu0 %596 }
 0x3b0   :  { %1780 = vrcp.f32 %v597_v21 }
 0x3b3   :  { %v729_v25 = vpop.xlane.xlu0 %728 }
 0x3b4   :  { %1782 = vrcp.f32 %v729_v25 }
 0x3b7   :  { %v861_v26 = vpop.xlane.xlu1 %860  ;;  %v993_v27 = vpop.xlane.xlu0 %992 }
 0x3b8   :  { %1784 = vrcp.f32 %v861_v26 }
 0x3b9   :  { %1786 = vrcp.f32 %v993_v27 }
 0x3ba   :  { %v1781_v22 = vpop.eup %1780 }
 0x3bb   :  { %v599_v23 = vmul.f32 %v1781_v22, %v1765_v51  ;;  %v866_v33 = vpop.permute.xlu1 %865 }
 0x3bc   :  { %v871_v36 = vsel %vm202_vm3, %v866_v33, 0 }
 0x3bd   :  { %v600_v24 = vpack.c.bf16 %v599_v23, %v599_v23 }
 0x3be   :  { %v1783_v28 = vpop.eup %1782 }
 0x3bf   :  { %1647 = vmatmul.mubr.msk.bf16.vlgmr.msra.gmra.mrb[16].mxu0 %vm137_vm2, %v600_v24  ;;  %v731_v30 = vmul.f32 %v1783_v28, %v2065_v53  ;;  %v998_v38 = vpop.permute.xlu1 %997 }
 0x3c0   :  { %1658 = vmatprep.mubr.msk.bf16.mxu0 %vm1846_vm0, %v1845_v0  ;;  %v1003_v41 = vsel %vm202_vm3, %v998_v38, 0 }
 0x3c1   :  { %v732_v34 = vpack.c.bf16 %v731_v30, %v731_v30 }
 0x3c2   :  { %v1785_v35 = vpop.eup %1784 }
 0x3c3   :  { %v863_v37 = vmul.f32 %v1785_v35, %v2067_v54  ;;  %v1787_v40 = vpop.eup %1786  ;;  %v1130_v43 = vpop.permute.xlu1 %1129 }
 0x3c4   :  { %v995_v42 = vmul.f32 %v1787_v40, %v2071_v56  ;;  %v1135_v46 = vsel %vm202_vm3, %v1130_v43, 0 }
 0x3c5   :  { %v864_v39 = vpack.c.bf16 %v863_v37, %v863_v37 }
 0x3c6   :  { %v996_v44 = vpack.c.bf16 %v995_v42, %v995_v42 }
 0x3cf   :  { %v1125_v29 = vpop.xlane.xlu0 %1124 }
 0x3d0   :  { %1788 = vrcp.f32 %v1125_v29 }
 0x3d3   :  { %v734_v31 = vpop.permute.xlu0 %733 }
 0x3d4   :  { %v739_v32 = vsel %vm202_vm3, %v734_v31, 0 }
 0x3d5   :  { %1657 = vmatpush3.bf16.msra.mxu0 %v739_v32 }
 0x3d6   :  { %1668 = vmatprep.subr.bf16.mxu0 %v1845_v0 }
 0x3d8   :  { %1659 = vmatmul.mubr.msk.bf16.vlgmr.msra.gmra.mrb[20].mxu0 %vm137_vm2, %v732_v34 }
 0x3d9   :  { %1669 = vmatpush3.bf16.msra.mxu0 %v871_v36  ;;  %1670 = vmatprep.mubr.msk.bf16.mxu0 %vm1846_vm0, %v1845_v0 }
 0x3da   :  { %1680 = vmatprep.subr.bf16.mxu0 %v1845_v0  ;;  %v1789_v45 = vpop.eup %1788 }
 0x3db   :  { %v1127_v47 = vmul.f32 %v1789_v45, %v2082_v63 }
 0x3dd   :  { %v1128_v48 = vpack.c.bf16 %v1127_v47, %v1127_v47  ;;  %v1749_v47 = vld [vmem:[%s2274_s3] sm:$0xff]  }
 0x3de   :  { %1699 = vmatpush3.bf16.msra.mxu1 %v1749_v47 }
 0x3df   :  { %1700 = vmatprep.subr.bf16.mxu1 %v1845_v0 }
 0x3e0   :  { %1671 = vmatmul.mubr.msk.bf16.vlgmr.msra.gmra.mrb[24].mxu0 %vm137_vm2, %v864_v39 }
 0x3e1   :  { %1681 = vmatpush3.bf16.msra.mxu0 %v1003_v41  ;;  %1682 = vmatprep.mubr.msk.bf16.mxu0 %vm1846_vm0, %v1845_v0 }
 0x3e2   :  { %1692 = vmatprep.subr.bf16.mxu0 %v1845_v0 }
 0x3e8   :  { %1683 = vmatmul.mubr.msk.bf16.vlgmr.msra.gmra.mrb[28].mxu0 %vm137_vm2, %v996_v44 }
 0x3e9   :  { %1693 = vmatpush3.bf16.msra.mxu0 %v1135_v46  ;;  %1694 = vmatprep.mubr.msk.bf16.mxu0 %vm1846_vm0, %v1845_v0 }
 0x3ea   :  { %1706 = vmatprep.subr.bf16.mxu0 %v1845_v0 }
 0x3f0   :  { %1695 = vmatmul.mubr.msk.bf16.vlgmr.msra.gmra.mrb[32].mxu0 %vm137_vm2, %v1128_v48  ;;  %v1750_v48 = vld [vmem:[%s2274_s3 + $0x8] sm:$0xff]  }
 0x3f1   :  { %1710 = vmatprep.mubr.msk.bf16.mxu0 %vm1846_vm0, %v1845_v0  ;;  %1701 = vmatpush3.bf16.msra.mxu1 %v1750_v48 }
 0x3f2   :  { %1714 = vmatprep.subr.bf16.mxu1 %v1845_v0 }
 0x455   :  { %v240_v49 = vpop.f32.mrb[4].mxu0 }
 0x456   :  { %246 = vst.msk [vmem:[#allocation4] sm:$0xff] %vm137_vm2, %v240_v49  ;;  %v1612_v9 = vpop.f32.mrb[5].mxu0 }
 0x457   :  { %v243_v50 = vpop.f32.mrb[6].mxu0 }
 0x458   :  { %v1613_v51 = vpop.f32.mrb[7].mxu0 }
 0x45d   :  { %v247_v52 = vld [vmem:[#allocation4] ss:$4 sm:$0x3]  ;;  %v251_v53 = vld [vmem:[#allocation4 + $0x1] ss:$4 sm:$0x3] }
 0x45e   :  { %v259_v54 = vld [vmem:[#allocation4 + $0x2] ss:$4 sm:$0x3]  ;;  %v267_v55 = vld [vmem:[#allocation4 + $0x3] ss:$4 sm:$0x3]  ;;  %253 = vrot.lane.b32.xlu1 %v251_v53, %s1857_s25 }
 0x45f   :  { %249 = vst.msk [vmem:[#allocation2] sm:$0x3] %vm248_vm4, %v247_v52  ;;  %v379_v56 = vpop.f32.mrb[8].mxu0  ;;  %261 = vrot.lane.b32.xlu0 %v259_v54, %s1858_s26 }
 0x460   :  { %385 = vst.msk [vmem:[#allocation4] sm:$0xff] %vm137_vm2, %v379_v56  ;;  %v1624_v57 = vpop.f32.mrb[9].mxu0 }
 0x461   :  { %v382_v58 = vpop.f32.mrb[10].mxu0 }
 0x462   :  { %v1625_v59 = vpop.f32.mrb[11].mxu0 }
 0x463   :  { %269 = vrot.lane.b32.xlu0 %v267_v55, %s1859_s27 }
 0x465   :  { %v511_v60 = vpop.f32.mrb[12].mxu0 }
 0x466   :  { %v1636_v61 = vpop.f32.mrb[13].mxu0 }
 0x467   :  { %v386_v62 = vld [vmem:[#allocation4] ss:$4 sm:$0x3]  ;;  %v388_v63 = vld [vmem:[#allocation4 + $0x1] ss:$4 sm:$0x3] }
 0x468   :  { %390 = vrot.lane.b32.xlu1 %v388_v63, %s1857_s25  ;;  %v514_v1 = vpop.f32.mrb[14].mxu0  ;;  %v394_v2 = vld [vmem:[#allocation4 + $0x2] ss:$4 sm:$0x3]  ;;  %387 = vst.msk [vmem:[#allocation2 + $0x2] sm:$0x3] %vm248_vm4, %v386_v62 }
 0x469   :  { %v1637_v4 = vpop.f32.mrb[15].mxu0  ;;  %v400_v5 = vld [vmem:[#allocation4 + $0x3] ss:$4 sm:$0x3] }
 0x46a   :  { %517 = vst.msk [vmem:[#allocation4] sm:$0xff] %vm137_vm2, %v511_v60 }
 0x46c   :  { %396 = vrot.lane.b32.xlu1 %v394_v2, %s1858_s26 }
 0x470   :  { %402 = vrot.lane.b32.xlu1 %v400_v5, %s1859_s27 }
 0x471   :  { %v520_v6 = vld [vmem:[#allocation4 + $0x1] ss:$4 sm:$0x3]  ;;  %v518_v7 = vld [vmem:[#allocation4] ss:$4 sm:$0x3] }
 0x472   :  { %522 = vrot.lane.b32.xlu0 %v520_v6, %s1857_s25  ;;  %519 = vst.msk [vmem:[#allocation2 + $0x4] sm:$0x3] %vm248_vm4, %v518_v7  ;;  %v526_v8 = vld [vmem:[#allocation4 + $0x2] ss:$4 sm:$0x3] }
 0x473   :  { %v532_v10 = vld [vmem:[#allocation4 + $0x3] ss:$4 sm:$0x3] }
 0x476   :  { %528 = vrot.lane.b32.xlu0 %v526_v8, %s1858_s26 }
 0x47a   :  { %534 = vrot.lane.b32.xlu0 %v532_v10, %s1859_s27 }
 0x492   :  { %v643_v12 = vpop.f32.mrb[16].mxu0 }
 0x493   :  { %649 = vst.msk [vmem:[#allocation4] sm:$0xff] %vm137_vm2, %v643_v12  ;;  %v1648_v11 = vpop.f32.mrb[17].mxu0 }
 0x494   :  { %v646_v13 = vpop.f32.mrb[18].mxu0 }
 0x495   :  { %v1649_v14 = vpop.f32.mrb[19].mxu0 }
 0x49a   :  { %v650_v15 = vld [vmem:[#allocation4] ss:$4 sm:$0x3]  ;;  %v652_v16 = vld [vmem:[#allocation4 + $0x1] ss:$4 sm:$0x3] }
 0x49b   :  { %654 = vrot.lane.b32.xlu1 %v652_v16, %s1857_s25  ;;  %651 = vst.msk [vmem:[#allocation2 + $0x6] sm:$0x3] %vm248_vm4, %v650_v15  ;;  %v658_v17 = vld [vmem:[#allocation4 + $0x2] ss:$4 sm:$0x3] }
 0x49c   :  { %v664_v18 = vld [vmem:[#allocation4 + $0x3] ss:$4 sm:$0x3] }
 0x49f   :  { %660 = vrot.lane.b32.xlu1 %v658_v17, %s1858_s26 }
 0x4a3   :  { %666 = vrot.lane.b32.xlu1 %v664_v18, %s1859_s27  ;;  %v1532_v18 = vld [vmem:[%s2275_s4] ss:$0 sm:$0xff] }
 0x4ab   :  { %v775_v19 = vpop.f32.mrb[20].mxu0 }
 0x4ac   :  { %781 = vst.msk [vmem:[#allocation4] sm:$0xff] %vm137_vm2, %v775_v19  ;;  %v1660_v20 = vpop.f32.mrb[21].mxu0  ;;  %v1268_v19 = vunpack.c.l.bf16 %v1948_v3 }
 0x4ad   :  { %v778_v21 = vpop.f32.mrb[22].mxu0 }
 0x4ae   :  { %v1661_v22 = vpop.f32.mrb[23].mxu0 }
 0x4b3   :  { %v782_v23 = vld [vmem:[#allocation4] ss:$4 sm:$0x3]  ;;  %v907_v24 = vpop.f32.mrb[24].mxu0 }
 0x4b4   :  { %v784_v25 = vld [vmem:[#allocation4 + $0x1] ss:$4 sm:$0x3]  ;;  %v1672_v26 = vpop.f32.mrb[25].mxu0  ;;  %783 = vst.msk [vmem:[#allocation2 + $0x8] sm:$0x3] %vm248_vm4, %v782_v23  ;;  %v1269_v23 = vunpack.c.h.bf16 %v1948_v3 }
 0x4b5   :  { %786 = vrot.lane.b32.xlu0 %v784_v25, %s1857_s25  ;;  %v910_v27 = vpop.f32.mrb[26].mxu0  ;;  %v790_v28 = vld [vmem:[#allocation4 + $0x2] ss:$4 sm:$0x3] }
 0x4b6   :  { %v1673_v29 = vpop.f32.mrb[27].mxu0  ;;  %v796_v30 = vld [vmem:[#allocation4 + $0x3] ss:$4 sm:$0x3] }
 0x4b7   :  { %913 = vst.msk [vmem:[#allocation4] sm:$0xff] %vm137_vm2, %v907_v24 }
 0x4b9   :  { %792 = vrot.lane.b32.xlu0 %v790_v28, %s1858_s26 }
 0x4bb   :  { %v1039_v31 = vpop.f32.mrb[28].mxu0 }
 0x4bc   :  { %v1684_v32 = vpop.f32.mrb[29].mxu0 }
 0x4bd   :  { %798 = vrot.lane.b32.xlu0 %v796_v30, %s1859_s27  ;;  %v1042_v33 = vpop.f32.mrb[30].mxu0 }
 0x4be   :  { %v914_v34 = vld [vmem:[#allocation4] ss:$4 sm:$0x3]  ;;  %v916_v35 = vld [vmem:[#allocation4 + $0x1] ss:$4 sm:$0x3] }
 0x4bf   :  { %v922_v36 = vld [vmem:[#allocation4 + $0x2] ss:$4 sm:$0x3]  ;;  %v928_v37 = vld [vmem:[#allocation4 + $0x3] ss:$4 sm:$0x3]  ;;  %918 = vrot.lane.b32.xlu1 %v916_v35, %s1857_s25 }
 0x4c0   :  { %915 = vst.msk [vmem:[#allocation2 + $0xa] sm:$0x3] %vm248_vm4, %v914_v34  ;;  %v1685_v38 = vpop.f32.mrb[31].mxu0 }
 0x4c1   :  { %1045 = vst.msk [vmem:[#allocation4] sm:$0xff] %vm137_vm2, %v1039_v31 }
 0x4c3   :  { %924 = vrot.lane.b32.xlu1 %v922_v36, %s1858_s26  ;;  %v1171_v39 = vpop.f32.mrb[32].mxu0 }
 0x4c4   :  { %v1696_v40 = vpop.f32.mrb[33].mxu0 }
 0x4c5   :  { %v1174_v41 = vpop.f32.mrb[34].mxu0  ;;  %v1751_v40 = vld [vmem:[%s2278_s7] sm:$0xff]  }
 0x4c6   :  { %v1697_v42 = vpop.f32.mrb[35].mxu0  ;;  %1707 = vmatpush3.bf16.msra.mxu0 %v1751_v40  ;;  %v1752_v41 = vld [vmem:[%s2278_s7 + $0x8] sm:$0xff]  }
 0x4c7   :  { %930 = vrot.lane.b32.xlu1 %v928_v37, %s1859_s27  ;;  %1708 = vmatprep.subr.bf16.mxu0 %v1845_v0  ;;  %v1753_v42 = vld [vmem:[%s2280_s9] sm:$0xff]  }
 0x4c8   :  { %v1046_v43 = vld [vmem:[#allocation4] ss:$4 sm:$0x3]  ;;  %v1048_v44 = vld [vmem:[#allocation4 + $0x1] ss:$4 sm:$0x3] }
 0x4c9   :  { %1050 = vrot.lane.b32.xlu0 %v1048_v44, %s1857_s25  ;;  %v1054_v45 = vld [vmem:[#allocation4 + $0x2] ss:$4 sm:$0x3]  ;;  %v1060_v46 = vld [vmem:[#allocation4 + $0x3] ss:$4 sm:$0x3] }
 0x4ca   :  { %1047 = vst.msk [vmem:[#allocation2 + $0xc] sm:$0x3] %vm248_vm4, %v1046_v43  ;;  %1709 = vmatpush3.bf16.msra.mxu0 %v1752_v41  ;;  %v1754_v43 = vld [vmem:[%s2280_s9 + $0x8] sm:$0xff]  }
 0x4cb   :  { %1177 = vst.msk [vmem:[#allocation4] sm:$0xff] %vm137_vm2, %v1171_v39 }
 0x4cd   :  { %1056 = vrot.lane.b32.xlu0 %v1054_v45, %s1858_s26 }
 0x4d0   :  { %v254_v9 = vpop.permute.xlu1 %253 }
 0x4d1   :  { %1062 = vrot.lane.b32.xlu0 %v1060_v46, %s1859_s27  ;;  %v262_v50 = vpop.permute.xlu0 %261  ;;  %257 = vst.msk [vmem:[#allocation2] sm:$0x3] %vm256_vm5, %v254_v9 }
 0x4d2   :  { %v1180_v49 = vld [vmem:[#allocation4 + $0x1] ss:$4 sm:$0x3]  ;;  %v1178_v51 = vld [vmem:[#allocation4] ss:$4 sm:$0x3] }
 0x4d3   :  { %1182 = vrot.lane.b32.xlu1 %v1180_v49, %s1857_s25  ;;  %265 = vst.msk [vmem:[#allocation2] sm:$0x3] %vm264_vm6, %v262_v50  ;;  %v1186_v52 = vld [vmem:[#allocation4 + $0x2] ss:$4 sm:$0x3] }
 0x4d4   :  { %1179 = vst.msk [vmem:[#allocation2 + $0xe] sm:$0x3] %vm248_vm4, %v1178_v51  ;;  %v1192_v54 = vld [vmem:[#allocation4 + $0x3] ss:$4 sm:$0x3] }
 0x4d5   :  { %v270_v53 = vpop.permute.xlu0 %269  ;;  %v1536_v50 = vld [vmem:[%s2276_s5] ss:$0 sm:$0xff] }
 0x4d6   :  { %273 = vst.msk [vmem:[#allocation2] sm:$0x3] %vm272_vm7, %v270_v53 }
 0x4d7   :  { %1188 = vrot.lane.b32.xlu1 %v1186_v52, %s1858_s26  ;;  %v1537_v52 = vld [vmem:[%s2277_s6] ss:$0 sm:$0xff] }
 0x4da   :  { %v391_v55 = vpop.permute.xlu1 %390 }
 0x4db   :  { %1194 = vrot.lane.b32.xlu1 %v1192_v54, %s1859_s27  ;;  %393 = vst.msk [vmem:[#allocation2 + $0x2] sm:$0x3] %vm256_vm5, %v391_v55 }
 0x4de   :  { %v397_v56 = vpop.permute.xlu1 %396 }
 0x4df   :  { %399 = vst.msk [vmem:[#allocation2 + $0x2] sm:$0x3] %vm264_vm6, %v397_v56 }
 0x4e2   :  { %v403_v57 = vpop.permute.xlu1 %402 }
 0x4e3   :  { %405 = vst.msk [vmem:[#allocation2 + $0x2] sm:$0x3] %vm272_vm7, %v403_v57 }
 0x4e4   :  { %v523_v58 = vpop.permute.xlu0 %522 }
 0x4e5   :  { %525 = vst.msk [vmem:[#allocation2 + $0x4] sm:$0x3] %vm256_vm5, %v523_v58 }
 0x4e8   :  { %v529_v59 = vpop.permute.xlu0 %528 }
 0x4e9   :  { %531 = vst.msk [vmem:[#allocation2 + $0x4] sm:$0x3] %vm264_vm6, %v529_v59 }
 0x4ec   :  { %v535_v60 = vpop.permute.xlu0 %534 }
 0x4ed   :  { %537 = vst.msk [vmem:[#allocation2 + $0x4] sm:$0x3] %vm272_vm7, %v535_v60 }
 0x50d   :  { %v655_v61 = vpop.permute.xlu1 %654 }
 0x50e   :  { %657 = vst.msk [vmem:[#allocation2 + $0x6] sm:$0x3] %vm256_vm5, %v655_v61 }
 0x511   :  { %v661_v62 = vpop.permute.xlu1 %660 }
 0x512   :  { %663 = vst.msk [vmem:[#allocation2 + $0x6] sm:$0x3] %vm264_vm6, %v661_v62  ;;  %v1755_v62 = vld [vmem:[%s2280_s9 + $0x10] sm:$0xff]  }
 0x515   :  { %v667_v63 = vpop.permute.xlu1 %666 }
 0x516   :  { %669 = vst.msk [vmem:[#allocation2 + $0x6] sm:$0x3] %vm272_vm7, %v667_v63  ;;  %v1756_v63 = vld [vmem:[%s2280_s9 + $0x18] sm:$0xff]   ;;  %s1860_s9 = smov [#allocation8]  }
 0x517   :  { %s1499_s28 = sshll.u32 %s1860_s9, 4  ;;  %s1500_s28 = int_to_ptr.vmem [resolvable:$true] %s1499_s28 }
 0x518   :  { %p1821_p9 = scmp.lt.s32.totalorder %s1500_s28, %s1500_s28 }
 0x51d   :  { %v1198_v15 = vld [vmem:[#allocation2] sm:$0xff] }
 0x527   :  { %v787_v1 = vpop.permute.xlu0 %786 }
 0x528   :  { %789 = vst.msk [vmem:[#allocation2 + $0x8] sm:$0x3] %vm256_vm5, %v787_v1  ;;  %v1538_v1 = vld [vmem:[%s2279_s8] ss:$0 sm:$0xff]  ;;  %s1816_s8 = scalar_lea.vmem %s1500_s28, 256 }
 0x529   :  { %p1817_p8 = scmp.ne.s32.totalorder %s1500_s28, %s1816_s8  ;;  %p1822_p10 = scmp.lt.s32.totalorder %s1816_s8, %s1816_s8 }
 0x52b   :  { %v793_v2 = vpop.permute.xlu0 %792  ;;  %p1823_p11 = por %p1822_p10, %p1821_p9 }
 0x52c   :  { %795 = vst.msk [vmem:[#allocation2 + $0x8] sm:$0x3] %vm264_vm6, %v793_v2 }
 0x52d   :  { %p1824_p12 = pnand %p1823_p11, %p1817_p8 }
 0x52f   :  { %v799_v4 = vpop.permute.xlu0 %798 }
 0x530   :  { %801 = vst.msk [vmem:[#allocation2 + $0x8] sm:$0x3] %vm272_vm7, %v799_v4 }
 0x531   :  { %v919_v5 = vpop.permute.xlu1 %918 }
 0x532   :  { %921 = vst.msk [vmem:[#allocation2 + $0xa] sm:$0x3] %vm256_vm5, %v919_v5 }
 0x535   :  { %v925_v6 = vpop.permute.xlu1 %924 }
 0x536   :  { %927 = vst.msk [vmem:[#allocation2 + $0xa] sm:$0x3] %vm264_vm6, %v925_v6 }
 0x539   :  { %v931_v7 = vpop.permute.xlu1 %930 }
 0x53a   :  { %933 = vst.msk [vmem:[#allocation2 + $0xa] sm:$0x3] %vm272_vm7, %v931_v7 }
 0x53b   :  { %v1051_v8 = vpop.permute.xlu0 %1050 }
 0x53c   :  { %1053 = vst.msk [vmem:[#allocation2 + $0xc] sm:$0x3] %vm256_vm5, %v1051_v8 }
 0x53f   :  { %v1057_v10 = vpop.permute.xlu0 %1056 }
 0x540   :  { %1059 = vst.msk [vmem:[#allocation2 + $0xc] sm:$0x3] %vm264_vm6, %v1057_v10 }
 0x543   :  { %v1063_v12 = vpop.permute.xlu0 %1062 }
 0x544   :  { %1065 = vst.msk [vmem:[#allocation2 + $0xc] sm:$0x3] %vm272_vm7, %v1063_v12 }
 0x545   :  { %v1183_v11 = vpop.permute.xlu1 %1182 }
 0x546   :  { %1185 = vst.msk [vmem:[#allocation2 + $0xe] sm:$0x3] %vm256_vm5, %v1183_v11 }
 0x549   :  { %v1189_v13 = vpop.permute.xlu1 %1188 }
 0x54a   :  { %1191 = vst.msk [vmem:[#allocation2 + $0xe] sm:$0x3] %vm264_vm6, %v1189_v13 }
 0x54d   :  { %v1195_v14 = vpop.permute.xlu1 %1194 }
 0x54e   :  { %1197 = vst.msk [vmem:[#allocation2 + $0xe] sm:$0x3] %vm272_vm7, %v1195_v14 }
 0x555   :  { %v1199_v16 = vld [vmem:[#allocation2 + $0x8] sm:$0xff] }
 0x556   :  { %v1200_v17 = vpack.c.bf16 %v1199_v16, %v1198_v15 }
 0x558   :  { %1703 = vmatmul.mubr.msk.bf16.vlgmr.msra.gmra.mrb[32].mxu1 %vm88_vm1, %v1200_v17 }
 0x559   :  { %1722 = vmatprep.mubr.msk.bf16.mxu1 %vm1846_vm0, %v1845_v0  ;;  %1715 = vmatpush3.bf16.msra.mxu1 %v1753_v42 }
 0x55a   :  { %1716 = vmatprep.subr.bf16.mxu1 %v1845_v0 }
 0x55d   :  { %1717 = vmatpush3.bf16.msra.mxu1 %v1754_v43 }
 0x55e   :  { %1718 = vmatprep.subr.bf16.mxu1 %v1845_v0 }
 0x561   :  { %1719 = vmatpush3.bf16.msra.mxu1 %v1755_v62 }
 0x562   :  { %1720 = vmatprep.subr.bf16.mxu1 %v1845_v0  ;;  %v1547_v0 = vld [vmem:[%s2281_s10] ss:$0 sm:$0xff] }
 0x565   :  { %1721 = vmatpush3.bf16.msra.mxu1 %v1756_v63 }
 0x62b   :  { %v1261_v20 = vpop.f32.mrb[32].mxu1 }
 0x62c   :  { %v1262_v21 = vadd.f32 %v1532_v18, %v1261_v20  ;;  %v1704_v22 = vpop.f32.mrb[33].mxu1 }
 0x62d   :  { %v1264_v24 = vpop.f32.mrb[34].mxu1 }
 0x62e   :  { %v1265_v25 = vadd.f32 %v1532_v18, %v1264_v24  ;;  %v1705_v26 = vpop.f32.mrb[35].mxu1  ;;  %v1270_v27 = vadd.f32 %v1268_v19, %v1262_v21 }
 0x630   :  { %v1272_v28 = vsel %vm88_vm1, %v1270_v27, 0.0  ;;  %v1271_v29 = vadd.f32 %v1269_v23, %v1265_v25 }
 0x631   :  { %1273 = vadd.xlane.f32.xlu0 %v1272_v28 }
 0x632   :  { %v1275_v30 = vsel %vm88_vm1, %v1271_v29, 0.0 }
 0x633   :  { %1276 = vadd.xlane.f32.xlu1 %v1275_v30 }
 0x6be   :  { %v1274_v31 = vpop.xlane.xlu0 %1273 }
 0x6bf   :  { %v1279_v32 = vmul.f32 0.03125, %v1274_v31 }
 0x6c0   :  { %v1277_v33 = vpop.xlane.xlu1 %1276 }
 0x6c1   :  { %v1281_v34 = vsub.f32 %v1270_v27, %v1279_v32  ;;  %v1280_v35 = vmul.f32 0.03125, %v1277_v33 }
 0x6c3   :  { %v1282_v36 = vsub.f32 %v1271_v29, %v1280_v35  ;;  %v1283_v37 = vmul.f32 %v1281_v34, %v1281_v34 }
 0x6c5   :  { %v1285_v3 = vsel %vm88_vm1, %v1283_v37, 0.0  ;;  %v1284_v38 = vmul.f32 %v1282_v36, %v1282_v36 }
 0x6c6   :  { %1286 = vadd.xlane.f32.xlu0 %v1285_v3 }
 0x6c7   :  { %v1288_v39 = vsel %vm88_vm1, %v1284_v38, 0.0 }
 0x6ca   :  { %1289 = vadd.xlane.f32.xlu0 %v1288_v39 }
 0x753   :  { %v1287_v44 = vpop.xlane.xlu0 %1286 }
 0x754   :  { %v1291_v45 = vmul.f32 0.03125, %v1287_v44 }
 0x756   :  { %v1293_v46 = vadd.f32 1e-05, %v1291_v45 }
 0x757   :  { %v1290_v47 = vpop.xlane.xlu0 %1289 }
 0x758   :  { %1790 = vrsqrt.f32 %v1293_v46  ;;  %v1292_v48 = vmul.f32 0.03125, %v1290_v47 }
 0x75a   :  { %v1294_v49 = vadd.f32 1e-05, %v1292_v48 }
 0x75c   :  { %1792 = vrsqrt.f32 %v1294_v49 }
 0x762   :  { %v1791_v9 = vpop.eup %1790 }
 0x763   :  { %v1297_v51 = vmul.f32 %v1791_v9, %v1281_v34 }
 0x765   :  { %v1306_v53 = vmul.f32 %v1536_v50, %v1297_v51 }
 0x766   :  { %v1793_v54 = vpop.eup %1792 }
 0x767   :  { %v1315_v55 = vadd.f32 %v1537_v52, %v1306_v53  ;;  %v1298_v56 = vmul.f32 %v1793_v54, %v1282_v36 }
 0x769   :  { %1317 = vst.msk [vmem:[#allocation3] sm:$0xff] %vm88_vm1, %v1315_v55  ;;  %v1307_v57 = vmul.f32 %v1536_v50, %v1298_v56 }
 0x76b   :  { %v1316_v58 = vadd.f32 %v1537_v52, %v1307_v57 }
 0x76d   :  { %1318 = vst.msk [vmem:[#allocation3 + $0x8] sm:$0xff] %vm88_vm1, %v1316_v58 }
 0x770   :  { %v1319_v59 = vld [vmem:[#allocation3] sm:$0xff] }
 0x774   :  { %v1320_v60 = vld [vmem:[#allocation3 + $0x8] sm:$0xff] }
 0x775   :  { %v1321_v61 = vpack.c.bf16 %v1320_v60, %v1319_v59 }
 0x777   :  { %1711 = vmatmul.mubr.msk.bf16.vlgmr.msra.gmra.mrb[36].mxu0 %vm88_vm1, %v1321_v61 }
 0x84a   :  { %v1383_v2 = vpop.f32.mrb[36].mxu0 }
 0x84b   :  { %v1384_v4 = vadd.f32 %v1538_v1, %v1383_v2  ;;  %v1712_v5 = vpop.f32.mrb[37].mxu0 }
 0x84c   :  { %v1386_v6 = vpop.f32.mrb[38].mxu0 }
 0x84d   :  { %v1387_v7 = vadd.f32 %v1538_v1, %v1386_v6  ;;  %v1713_v8 = vpop.f32.mrb[39].mxu0  ;;  %v1390_v10 = vmax.f32 %v1384_v4, 0.0 }
 0x84f   :  { %v1391_v12 = vmax.f32 %v1387_v7, 0.0 }
 0x851   :  { %v1392_v11 = vpack.c.bf16 %v1391_v12, %v1390_v10 }
 0x853   :  { %1723 = vmatmul.mubr.msk.bf16.vlgmr.msra.gmra.mrb[36].mxu1 %vm1425_vm8, %v1392_v11 }
 0x926   :  { %v1463_v13 = vpop.f32.mrb[36].mxu1 }
 0x927   :  { %v1480_v14 = vadd.f32 %v1547_v0, %v1463_v13  ;;  %v1724_v15 = vpop.f32.mrb[37].mxu1 }
 0x928   :  { %v1466_v16 = vpop.f32.mrb[38].mxu1 }
 0x929   :  { %1482 = vst.msk [vmem:[#allocation8] sm:$0xff] %vm88_vm1, %v1480_v14  ;;  %v1481_v17 = vadd.f32 %v1547_v0, %v1466_v16  ;;  %v1725_v18 = vpop.f32.mrb[39].mxu1 }
 0x92b   :  { %1483 = vst.msk [vmem:[#allocation8 + $0x8] sm:$0xff] %vm88_vm1, %v1481_v17 }
 0x92c   :  { %1827 = shalt.err (!%p1824_p12)
}
 0x92d   :  { %s1828_s30 = scalar_lea.hbm %s2282_s11, 256 }
 0x92e   :  { %p1829_p13 = scmp.ne.s32.totalorder %s2282_s11, %s1828_s30  ;;  %p1832_p0 = scmp.lt.u32.totalorder %s1828_s30, %s2282_s11 }
 0x930   :  { %p1834_p1 = pnand %p1832_p0, %p1829_p13 }
 0x932   :  { %1837 = shalt.err (!%p1834_p1)
}
 0x933   :  { %s1861_s0 = smov 128  }
 0x934   :  { %1505 = dma.vmem_to_hbm [thread:$0]  %s1500_s28, 256, %s2282_s11, [#allocation7], %s1861_s0, %s1861_s0, %s1857_s25  }
 0x935   :  { %1840 = dma.done.wait [#allocation7], 256  }
 0x936   :  { %1841 = vsyncadd [#allocation7], 4294967040 }
 0x937   :  { %1509 = vsyncpa [#allocation6], 1 }
 0x938   :  { %1510 = vsyncpa [#allocation7], 1 }

</bundles_post_ra>
